<compile_context>
chip_gen: v7x
topology: tpu7x:2x2x1
jax: 0.10.0
libtpu: 0.0.40
codegen_flags: <defaults>
</compile_context>

<pallas_src>
import functools
import math

import jax
import jax.numpy as jnp
from jax.experimental import pallas as pl
from jax.experimental.pallas import tpu as pltpu


# ----------------------------- configuration ------------------------------
Z_DIM = 8
D_IN = 64
NUMBER_F = 8
FILTER_W = 2.0
BATCH = 2

LANE = 128          # lane width / padded D_in
B_PAD = 8           # sublane-padded batch

PSD_ROW = 13
N_BIAS_ROWS = 16    # 13 biases + psd, padded to 16 sublanes
BIAS_COLS = 384     # widest bias is 300 -> 384 lanes

# Weight groups.  "pre" is tiny and needed immediately -> auto-staged VMEM
# input.  The rest are DMA'd manually (memory_space=pl.ANY) in execution
# order so the copies overlap the matmul chain.
_PRE_GROUP = ("pre", 16, 384)            # pre0 | pre1 | pre2 (side by side)
_DMA_GROUPS = [
    ("g1a", 128, 384),   # g1_0
    ("g1b", 384, 256),   # g1_1
    ("g1cd", 384, 128),  # g1_2 (rows 0:256) | g1_3 (rows 256:384)
    ("mid", 16, 256),    # g1_4 (lanes 0:128) | fused g2_0 (lanes 128:256)
    ("g2a", 128, 256),   # g2_1
    ("g2b", 256, 384),   # g2_2
    ("g2cd", 512, 128),  # g2_3 (rows 0:384) | g2_4 (rows 384:512)
]
_DMA_INDEX = {name: i for i, (name, _, _) in enumerate(_DMA_GROUPS)}

# (name, w key, b key, bias row, K real, N real, K pad, N pad, group, row off, lane off)
_LAYERS = [
    ("pre0", "pre_w0", "pre_b0", 0, Z_DIM, NUMBER_F, 16, 128, "pre", 0, 0),
    ("pre1", "pre_w1", "pre_b1", 1, NUMBER_F, NUMBER_F, 16, 128, "pre", 0, 128),
    ("pre2", "pre_w2", "pre_b2", 2, NUMBER_F, NUMBER_F, 16, 128, "pre", 0, 256),
    ("g1_0", "g1_w0", "g1_b0", 3, D_IN, 300, 128, 384, "g1a", 0, 0),
    ("g1_1", "g1_w1", "g1_b1", 4, 300, 150, 384, 256, "g1b", 0, 0),
    ("g1_2", "g1_w2", "g1_b2", 5, 150, 70, 256, 128, "g1cd", 0, 0),
    ("g1_3", "g1_w3", "g1_b3", 6, 70, NUMBER_F, 128, 128, "g1cd", 256, 0),
    ("g1_4", "g1_w4", "g1_b4", 7, NUMBER_F, NUMBER_F, 16, 128, "mid", 0, 0),
    ("g2_0", "g2_w0", "g2_b0", 8, NUMBER_F + Z_DIM, 70, 16, 128, "mid", 0, 128),
    ("g2_1", "g2_w1", "g2_b1", 9, 70, 150, 128, 256, "g2a", 0, 0),
    ("g2_2", "g2_w2", "g2_b2", 10, 150, 300, 256, 384, "g2b", 0, 0),
    ("g2_3", "g2_w3", "g2_b3", 11, 300, D_IN, 384, 128, "g2cd", 0, 0),
    ("g2_4", "g2_w4", "g2_b4", 12, D_IN, D_IN, 128, 128, "g2cd", 384, 0),
]

# name -> (group, row off, lane off, K pad, N pad, bias row)   (static, trace-time)
_META = {l[0]: (l[8], l[9], l[10], l[6], l[7], l[3]) for l in _LAYERS}


# ------------------------------- kernel -----------------------------------
def decoder_v2_kernel(z_ref, b_ref, w_pre_ref, *rest, n_dma, meta, dma_index,
                      d_in, number_f, filter_w, psd_row):
    w_hbm = rest[:n_dma]
    out_ref = rest[n_dma]
    w_vmem = rest[n_dma + 1:2 * n_dma + 1]
    dma_sem = rest[2 * n_dma + 1]
    f32 = jnp.float32

    # Issue every weight-group DMA up front (HBM -> VMEM scratch).  They are
    # ordered by first use, so the lazy waits below almost never stall.
    copies = [pltpu.make_async_copy(w_hbm[i], w_vmem[i], dma_sem.at[i])
              for i in range(n_dma)]
    for cp in copies:
        cp.start()
    ready = [False] * n_dma                     # trace-time bookkeeping only

    def weight(name):
        grp, r0, c0, kp, npd, _ = meta[name]
        if grp == "pre":
            src = w_pre_ref                     # auto-staged VMEM input
        else:
            i = dma_index[grp]
            if not ready[i]:
                copies[i].wait()
                ready[i] = True
            src = w_vmem[i]
        return src[r0:r0 + kp, c0:c0 + npd]     # static, tile-aligned view

    def bias(name):
        _, _, _, _, npd, brow = meta[name]
        return b_ref[brow:brow + 1, :npd]       # (1, npd) f32

    def linear(x, name):
        kp = meta[name][3]
        y = jnp.dot(x[:, :kp].astype(jnp.bfloat16), weight(name),
                    preferred_element_type=f32)
        return y + bias(name)

    z = z_ref[...]                              # (B_PAD, 128) f32

    # ---- self.pre : Lin/ReLU, Lin/ReLU, Lin/Sigmoid; f0_rec = D_in * (.) ---
    h = jax.nn.relu(linear(z, "pre0"))
    h = jax.nn.relu(linear(h, "pre1"))
    f0 = f32(d_in) * jax.nn.sigmoid(linear(h, "pre2"))
    # zero padded lanes immediately (sigmoid(0)=0.5 would leave 32.0 there)
    lane = jax.lax.broadcasted_iota(jnp.int32, f0.shape, 1)
    f0 = jnp.where(lane < number_f, f0, f32(0.0))          # (B_PAD, 128)

    # ---- Gaussian filter bank (vectorized over the number_f axis) ----------
    # H_f[b, k] = sum_i normal(k, f0[b, i], filter_w)
    k_row = jax.lax.broadcasted_iota(jnp.int32, (1, LANE), 1).astype(f32)
    mu3 = jnp.stack([f0[:, i:i + 1] for i in range(number_f)], axis=0)  # (nf,B,1)
    dlt = (k_row[None, :, :] - mu3) * f32(1.0 / filter_w)               # (nf,B,128)
    norm_c = f32(1.0 / (filter_w * math.sqrt(2.0 * math.pi)))
    h_f = norm_c * jnp.sum(jnp.exp(f32(-0.5) * dlt * dlt), axis=0)      # (B,128)
    # psd row is zero beyond d_in -> x_rec padded lanes are exactly 0
    x_rec = b_ref[psd_row:psd_row + 1, :LANE] * h_f

    # ---- generator_1: Lin/ReLU x3, Lin, Lin --------------------------------
    g = jax.nn.relu(linear(x_rec, "g1_0"))
    g = jax.nn.relu(linear(g, "g1_1"))
    g = jax.nn.relu(linear(g, "g1_2"))
    g = linear(g, "g1_3")
    g = linear(g, "g1_4")                       # (B_PAD, 128), lanes >= 8 are 0

    # ---- cat((g, z), dim=1) as a lane-pack, then generator_2 (fused layer 0)
    cat = g + pltpu.roll(z, shift=number_f, axis=1)   # z into lanes [8, 16)
    h2 = jax.nn.relu(linear(cat, "g2_0"))
    h2 = jax.nn.relu(linear(h2, "g2_1"))
    h2 = jax.nn.relu(linear(h2, "g2_2"))
    h2 = linear(h2, "g2_3")
    h2 = linear(h2, "g2_4")                     # (B_PAD, 128), lanes >= d_in are 0

    # ---- pack both outputs into one lane-dense 128-wide slab ----------------
    # lanes [0, d_in): x_rec_final ; lanes [d_in, d_in+number_f): f0_rec
    out_ref[...] = h2 + pltpu.roll(f0, shift=d_in, axis=1)


# ------------------------- parameter slab packing ---------------------------
def pack_params(params):
    """Pack all linear weights into dense bf16 groups and all biases + psd
    into one f32 slab.  Call ONCE at parameter-load time and reuse."""
    slabs = {_PRE_GROUP[0]: jnp.zeros(_PRE_GROUP[1:], jnp.float32)}
    for gname, r, c in _DMA_GROUPS:
        slabs[gname] = jnp.zeros((r, c), jnp.float32)
    b_slab = jnp.zeros((N_BIAS_ROWS, BIAS_COLS), jnp.float32)
    for (name, wkey, bkey, brow, kr, nr, _kp, _npd, grp, r0, c0) in _LAYERS:
        w = params[wkey]                                  # (in_dim, out_dim)
        slabs[grp] = slabs[grp].at[r0:r0 + kr, c0:c0 + nr].set(w)
        b_slab = b_slab.at[brow, :nr].set(params[bkey].reshape(-1))
    b_slab = b_slab.at[PSD_ROW, :D_IN].set(params["psd"].reshape(-1))
    w_pre = slabs[_PRE_GROUP[0]].astype(jnp.bfloat16)
    w_dma = tuple(slabs[g].astype(jnp.bfloat16) for g, _, _ in _DMA_GROUPS)
    return w_pre, w_dma, b_slab


# ------------------------------- wrapper -----------------------------------
@jax.jit
def _decoder_v2_call(z, w_pre, w_dma, b_slab):
    batch = z.shape[0]
    z_pad = jnp.zeros((B_PAD, LANE), jnp.float32).at[:batch, :Z_DIM].set(
        z.astype(jnp.float32))

    kernel = functools.partial(
        decoder_v2_kernel, n_dma=len(_DMA_GROUPS), meta=_META,
        dma_index=_DMA_INDEX, d_in=D_IN, number_f=NUMBER_F,
        filter_w=FILTER_W, psd_row=PSD_ROW)

    real_flops = 2 * batch * sum(l[4] * l[5] for l in _LAYERS)
    weight_bytes = 2 * (w_pre.size + sum(a.size for a in w_dma))
    cost = pl.CostEstimate(
        flops=real_flops + 8 * batch * NUMBER_F * D_IN,
        transcendentals=batch * NUMBER_F * D_IN + 3 * batch * NUMBER_F,
        bytes_accessed=weight_bytes + b_slab.size * 4 + z_pad.size * 4
        + B_PAD * LANE * 4,
    )

    vmem = pl.BlockSpec(memory_space=pltpu.MemorySpace.VMEM)
    hbm = pl.BlockSpec(memory_space=pl.ANY)
    out = pl.pallas_call(
        kernel,
        out_shape=jax.ShapeDtypeStruct((B_PAD, LANE), jnp.float32),
        in_specs=[vmem, vmem, vmem] + [hbm] * len(_DMA_GROUPS),
        out_specs=vmem,
        scratch_shapes=[pltpu.VMEM((r, c), jnp.bfloat16)
                        for _, r, c in _DMA_GROUPS]
        + [pltpu.SemaphoreType.DMA((len(_DMA_GROUPS),))],
        cost_estimate=cost,
    )(z_pad, b_slab, w_pre, *w_dma)

    return out[:batch, :D_IN], out[:batch, D_IN:D_IN + NUMBER_F]


def decoder_v2_forward(f_0, z, x_orig, packed):
    """Forward pass of Decoder_v2.  `f_0` is unused by the reference forward
    (kept for signature parity); `packed` comes from pack_params()."""
    del f_0
    batch, z_dim = z.shape
    assert z_dim == Z_DIM and x_orig.shape == (batch, D_IN) and batch <= B_PAD
    w_pre, w_dma, b_slab = packed
    return _decoder_v2_call(z, w_pre, w_dma, b_slab)


# -------------------------- parameter construction -------------------------
def make_params(key):
    params = {}
    defs = [
        ("pre_w0", "pre_b0", Z_DIM, NUMBER_F),
        ("pre_w1", "pre_b1", NUMBER_F, NUMBER_F),
        ("pre_w2", "pre_b2", NUMBER_F, NUMBER_F),
        ("g1_w0", "g1_b0", D_IN, 300),
        ("g1_w1", "g1_b1", 300, 150),
        ("g1_w2", "g1_b2", 150, 70),
        ("g1_w3", "g1_b3", 70, NUMBER_F),
        ("g1_w4", "g1_b4", NUMBER_F, NUMBER_F),
        ("g2_w0", "g2_b0", NUMBER_F + Z_DIM, 70),
        ("g2_w1", "g2_b1", 70, 150),
        ("g2_w2", "g2_b2", 150, 300),
        ("g2_w3", "g2_b3", 300, D_IN),
        ("g2_w4", "g2_b4", D_IN, D_IN),
    ]
    keys = jax.random.split(key, len(defs) + 1)
    for (wk, bk, din, dout), k in zip(defs, keys[:-1]):
        kw, kb = jax.random.split(k)
        bound = 1.0 / math.sqrt(din)
        # weights stored pre-transposed: (in_dim, out_dim); bias as (1, out_dim)
        params[wk] = jax.random.uniform(kw, (din, dout), jnp.float32, -bound, bound)
        params[bk] = jax.random.uniform(kb, (1, dout), jnp.float32, -bound, bound)
    params["psd"] = jax.random.uniform(keys[-1], (D_IN,), jnp.float32, 0.5, 1.5)
    return params


# ------------------------------ pure-JAX reference -------------------------
def _bf16_round(x):
    return x.astype(jnp.bfloat16).astype(jnp.float32)


def reference_forward(z, params):
    """Module semantics with matmul inputs rounded to bf16 (as the kernel does)
    and fp32 accumulation, so tolerances can stay tight."""
    def lin(x, w, b):
        return jnp.dot(_bf16_round(x), _bf16_round(w),
                       preferred_element_type=jnp.float32) + b.reshape(1, -1)

    h = jax.nn.relu(lin(z, params["pre_w0"], params["pre_b0"]))
    h = jax.nn.relu(lin(h, params["pre_w1"], params["pre_b1"]))
    h = jax.nn.sigmoid(lin(h, params["pre_w2"], params["pre_b2"]))
    f0_rec = D_IN * h

    f = jnp.arange(D_IN, dtype=jnp.float32)
    d = (f[None, None, :] - f0_rec[:, :, None]) / FILTER_W
    h_f = jnp.sum(jnp.exp(-0.5 * d * d), axis=1) / (FILTER_W * math.sqrt(2 * math.pi))
    x_rec = params["psd"][None, :] * h_f

    g = jax.nn.relu(lin(x_rec, params["g1_w0"], params["g1_b0"]))
    g = jax.nn.relu(lin(g, params["g1_w1"], params["g1_b1"]))
    g = jax.nn.relu(lin(g, params["g1_w2"], params["g1_b2"]))
    g = lin(g, params["g1_w3"], params["g1_b3"])
    g = lin(g, params["g1_w4"], params["g1_b4"])

    cat = jnp.concatenate([g, z], axis=1)
    h2 = jax.nn.relu(lin(cat, params["g2_w0"], params["g2_b0"]))
    h2 = jax.nn.relu(lin(h2, params["g2_w1"], params["g2_b1"]))
    h2 = jax.nn.relu(lin(h2, params["g2_w2"], params["g2_b2"]))
    h2 = lin(h2, params["g2_w3"], params["g2_b3"])
    h2 = lin(h2, params["g2_w4"], params["g2_b4"])
    return h2, f0_rec


# ---------------------------------- main ------------------------------------
if __name__ == "__main__":
    key = jax.random.PRNGKey(0)
    k_params, k_z, k_x, k_f0 = jax.random.split(key, 4)

    params = make_params(k_params)
    z = jax.random.normal(k_z, (BATCH, Z_DIM), jnp.float32)
    x_orig = jax.random.normal(k_x, (BATCH, D_IN), jnp.float32)
    f_0 = jax.random.normal(k_f0, (BATCH, NUMBER_F), jnp.float32)  # unused by forward

    # Pack once (parameter-load time), reuse for every forward call.
    packed = pack_params(params)
    jax.block_until_ready(packed)

    x_rec_final, f0_rec = decoder_v2_forward(f_0, z, x_orig, packed)
    jax.block_until_ready((x_rec_final, f0_rec))

    x_ref, f0_ref = reference_forward(z, params)
    assert x_rec_final.shape == (BATCH, D_IN)
    assert f0_rec.shape == (BATCH, NUMBER_F)
    assert jnp.allclose(x_rec_final, x_ref, atol=5e-3, rtol=5e-3)
    assert jnp.allclose(f0_rec, f0_ref, atol=5e-3, rtol=5e-3)

    print("KERNEL_OK")
</pallas_src>

<mosaic_0001>
module attributes {stable_mosaic.version = 11 : i64} {
  func.func @decoder_v2_kernel(%arg0: memref<8x128xf32, #tpu.memory_space<vmem>>, %arg1: memref<16x384xf32, #tpu.memory_space<vmem>>, %arg2: memref<16x384xbf16, #tpu.memory_space<vmem>>, %arg3: memref<128x384xbf16, #tpu.memory_space<any>>, %arg4: memref<384x256xbf16, #tpu.memory_space<any>>, %arg5: memref<384x128xbf16, #tpu.memory_space<any>>, %arg6: memref<16x256xbf16, #tpu.memory_space<any>>, %arg7: memref<128x256xbf16, #tpu.memory_space<any>>, %arg8: memref<256x384xbf16, #tpu.memory_space<any>>, %arg9: memref<512x128xbf16, #tpu.memory_space<any>>, %arg10: memref<8x128xf32, #tpu.memory_space<vmem>>, %arg11: memref<128x384xbf16, #tpu.memory_space<vmem>>, %arg12: memref<384x256xbf16, #tpu.memory_space<vmem>>, %arg13: memref<384x128xbf16, #tpu.memory_space<vmem>>, %arg14: memref<16x256xbf16, #tpu.memory_space<vmem>>, %arg15: memref<128x256xbf16, #tpu.memory_space<vmem>>, %arg16: memref<256x384xbf16, #tpu.memory_space<vmem>>, %arg17: memref<512x128xbf16, #tpu.memory_space<vmem>>, %arg18: memref<7x!tpu.dma_semaphore, #tpu.memory_space<semaphore_mem>>) attributes {dimension_semantics = [], scalar_prefetch = 0 : i64, scratch_operands = 8 : i64, tpu.core_type = #tpu.core_type<tc>} {
    %c0_i32 = arith.constant 0 : i32
    %0 = tpu.memref_slice %arg18[%c0_i32] : memref<7x!tpu.dma_semaphore, #tpu.memory_space<semaphore_mem>> -> memref<1x!tpu.dma_semaphore, #tpu.memory_space<semaphore_mem>>
    %1 = tpu.memref_squeeze %0 : memref<1x!tpu.dma_semaphore, #tpu.memory_space<semaphore_mem>> -> memref<!tpu.dma_semaphore, #tpu.memory_space<semaphore_mem>>
    tpu.enqueue_dma source(%arg3 : memref<128x384xbf16, #tpu.memory_space<any>>) target(%arg11 : memref<128x384xbf16, #tpu.memory_space<vmem>>) target_semaphore(%1 : memref<!tpu.dma_semaphore, #tpu.memory_space<semaphore_mem>>)
    %c1_i32 = arith.constant 1 : i32
    %2 = tpu.memref_slice %arg18[%c1_i32] : memref<7x!tpu.dma_semaphore, #tpu.memory_space<semaphore_mem>> -> memref<1x!tpu.dma_semaphore, #tpu.memory_space<semaphore_mem>>
    %3 = tpu.memref_squeeze %2 : memref<1x!tpu.dma_semaphore, #tpu.memory_space<semaphore_mem>> -> memref<!tpu.dma_semaphore, #tpu.memory_space<semaphore_mem>>
    tpu.enqueue_dma source(%arg4 : memref<384x256xbf16, #tpu.memory_space<any>>) target(%arg12 : memref<384x256xbf16, #tpu.memory_space<vmem>>) target_semaphore(%3 : memref<!tpu.dma_semaphore, #tpu.memory_space<semaphore_mem>>)
    %c2_i32 = arith.constant 2 : i32
    %4 = tpu.memref_slice %arg18[%c2_i32] : memref<7x!tpu.dma_semaphore, #tpu.memory_space<semaphore_mem>> -> memref<1x!tpu.dma_semaphore, #tpu.memory_space<semaphore_mem>>
    %5 = tpu.memref_squeeze %4 : memref<1x!tpu.dma_semaphore, #tpu.memory_space<semaphore_mem>> -> memref<!tpu.dma_semaphore, #tpu.memory_space<semaphore_mem>>
    tpu.enqueue_dma source(%arg5 : memref<384x128xbf16, #tpu.memory_space<any>>) target(%arg13 : memref<384x128xbf16, #tpu.memory_space<vmem>>) target_semaphore(%5 : memref<!tpu.dma_semaphore, #tpu.memory_space<semaphore_mem>>)
    %c3_i32 = arith.constant 3 : i32
    %6 = tpu.memref_slice %arg18[%c3_i32] : memref<7x!tpu.dma_semaphore, #tpu.memory_space<semaphore_mem>> -> memref<1x!tpu.dma_semaphore, #tpu.memory_space<semaphore_mem>>
    %7 = tpu.memref_squeeze %6 : memref<1x!tpu.dma_semaphore, #tpu.memory_space<semaphore_mem>> -> memref<!tpu.dma_semaphore, #tpu.memory_space<semaphore_mem>>
    tpu.enqueue_dma source(%arg6 : memref<16x256xbf16, #tpu.memory_space<any>>) target(%arg14 : memref<16x256xbf16, #tpu.memory_space<vmem>>) target_semaphore(%7 : memref<!tpu.dma_semaphore, #tpu.memory_space<semaphore_mem>>)
    %c4_i32 = arith.constant 4 : i32
    %8 = tpu.memref_slice %arg18[%c4_i32] : memref<7x!tpu.dma_semaphore, #tpu.memory_space<semaphore_mem>> -> memref<1x!tpu.dma_semaphore, #tpu.memory_space<semaphore_mem>>
    %9 = tpu.memref_squeeze %8 : memref<1x!tpu.dma_semaphore, #tpu.memory_space<semaphore_mem>> -> memref<!tpu.dma_semaphore, #tpu.memory_space<semaphore_mem>>
    tpu.enqueue_dma source(%arg7 : memref<128x256xbf16, #tpu.memory_space<any>>) target(%arg15 : memref<128x256xbf16, #tpu.memory_space<vmem>>) target_semaphore(%9 : memref<!tpu.dma_semaphore, #tpu.memory_space<semaphore_mem>>)
    %c5_i32 = arith.constant 5 : i32
    %10 = tpu.memref_slice %arg18[%c5_i32] : memref<7x!tpu.dma_semaphore, #tpu.memory_space<semaphore_mem>> -> memref<1x!tpu.dma_semaphore, #tpu.memory_space<semaphore_mem>>
    %11 = tpu.memref_squeeze %10 : memref<1x!tpu.dma_semaphore, #tpu.memory_space<semaphore_mem>> -> memref<!tpu.dma_semaphore, #tpu.memory_space<semaphore_mem>>
    tpu.enqueue_dma source(%arg8 : memref<256x384xbf16, #tpu.memory_space<any>>) target(%arg16 : memref<256x384xbf16, #tpu.memory_space<vmem>>) target_semaphore(%11 : memref<!tpu.dma_semaphore, #tpu.memory_space<semaphore_mem>>)
    %c6_i32 = arith.constant 6 : i32
    %12 = tpu.memref_slice %arg18[%c6_i32] : memref<7x!tpu.dma_semaphore, #tpu.memory_space<semaphore_mem>> -> memref<1x!tpu.dma_semaphore, #tpu.memory_space<semaphore_mem>>
    %13 = tpu.memref_squeeze %12 : memref<1x!tpu.dma_semaphore, #tpu.memory_space<semaphore_mem>> -> memref<!tpu.dma_semaphore, #tpu.memory_space<semaphore_mem>>
    tpu.enqueue_dma source(%arg9 : memref<512x128xbf16, #tpu.memory_space<any>>) target(%arg17 : memref<512x128xbf16, #tpu.memory_space<vmem>>) target_semaphore(%13 : memref<!tpu.dma_semaphore, #tpu.memory_space<semaphore_mem>>)
    %c0 = arith.constant 0 : index
    %c0_0 = arith.constant 0 : index
    %14 = vector.load %arg0[%c0, %c0_0] : memref<8x128xf32, #tpu.memory_space<vmem>>, vector<8x128xf32>
    %15 = vector.extract_strided_slice %14 {offsets = [0, 0], sizes = [8, 16], strides = [1, 1]} : vector<8x128xf32> to vector<8x16xf32>
    %16 = arith.truncf %15 : vector<8x16xf32> to vector<8x16xbf16>
    %c0_1 = arith.constant 0 : index
    %c0_2 = arith.constant 0 : index
    %17 = vector.load %arg2[%c0_1, %c0_2] : memref<16x384xbf16, #tpu.memory_space<vmem>>, vector<16x128xbf16>
    %cst = arith.constant dense<0.000000e+00> : vector<8x128xf32>
    %18 = tpu.matmul %16, %17, %cst {dimension_numbers = #tpu.dot_dimension_numbers<[1], [0], [0], [1], [0, 0, 1, 1], [], []>} : vector<8x16xbf16>, vector<16x128xbf16>, vector<8x128xf32> -> vector<8x128xf32>
    %c0_3 = arith.constant 0 : index
    %c0_4 = arith.constant 0 : index
    %19 = vector.load %arg1[%c0_3, %c0_4] : memref<16x384xf32, #tpu.memory_space<vmem>>, vector<1x128xf32>
    %20 = vector.broadcast %19 : vector<1x128xf32> to vector<8x128xf32>
    %21 = arith.addf %18, %20 : vector<8x128xf32>
    %cst_5 = arith.constant 0.000000e+00 : f32
    %22 = vector.broadcast %cst_5 : f32 to vector<8x128xf32>
    %23 = arith.maximumf %21, %22 : vector<8x128xf32>
    %24 = vector.extract_strided_slice %23 {offsets = [0, 0], sizes = [8, 16], strides = [1, 1]} : vector<8x128xf32> to vector<8x16xf32>
    %25 = arith.truncf %24 : vector<8x16xf32> to vector<8x16xbf16>
    %c0_6 = arith.constant 0 : index
    %c128 = arith.constant 128 : index
    %26 = vector.load %arg2[%c0_6, %c128] : memref<16x384xbf16, #tpu.memory_space<vmem>>, vector<16x128xbf16>
    %cst_7 = arith.constant dense<0.000000e+00> : vector<8x128xf32>
    %27 = tpu.matmul %25, %26, %cst_7 {dimension_numbers = #tpu.dot_dimension_numbers<[1], [0], [0], [1], [0, 0, 1, 1], [], []>} : vector<8x16xbf16>, vector<16x128xbf16>, vector<8x128xf32> -> vector<8x128xf32>
    %c1 = arith.constant 1 : index
    %c0_8 = arith.constant 0 : index
    %28 = vector.load %arg1[%c1, %c0_8] : memref<16x384xf32, #tpu.memory_space<vmem>>, vector<1x128xf32>
    %29 = vector.broadcast %28 : vector<1x128xf32> to vector<8x128xf32>
    %30 = arith.addf %27, %29 : vector<8x128xf32>
    %cst_9 = arith.constant 0.000000e+00 : f32
    %31 = vector.broadcast %cst_9 : f32 to vector<8x128xf32>
    %32 = arith.maximumf %30, %31 : vector<8x128xf32>
    %33 = vector.extract_strided_slice %32 {offsets = [0, 0], sizes = [8, 16], strides = [1, 1]} : vector<8x128xf32> to vector<8x16xf32>
    %34 = arith.truncf %33 : vector<8x16xf32> to vector<8x16xbf16>
    %c0_10 = arith.constant 0 : index
    %c256 = arith.constant 256 : index
    %35 = vector.load %arg2[%c0_10, %c256] : memref<16x384xbf16, #tpu.memory_space<vmem>>, vector<16x128xbf16>
    %cst_11 = arith.constant dense<0.000000e+00> : vector<8x128xf32>
    %36 = tpu.matmul %34, %35, %cst_11 {dimension_numbers = #tpu.dot_dimension_numbers<[1], [0], [0], [1], [0, 0, 1, 1], [], []>} : vector<8x16xbf16>, vector<16x128xbf16>, vector<8x128xf32> -> vector<8x128xf32>
    %c2 = arith.constant 2 : index
    %c0_12 = arith.constant 0 : index
    %37 = vector.load %arg1[%c2, %c0_12] : memref<16x384xf32, #tpu.memory_space<vmem>>, vector<1x128xf32>
    %38 = vector.broadcast %37 : vector<1x128xf32> to vector<8x128xf32>
    %39 = arith.addf %36, %38 : vector<8x128xf32>
    %40 = arith.negf %39 : vector<8x128xf32>
    %41 = math.exp %40 : vector<8x128xf32>
    %cst_13 = arith.constant 1.000000e+00 : f32
    %42 = vector.broadcast %cst_13 : f32 to vector<8x128xf32>
    %43 = arith.addf %42, %41 : vector<8x128xf32>
    %44 = arith.divf %42, %43 : vector<8x128xf32>
    %cst_14 = arith.constant 6.400000e+01 : f32
    %45 = vector.broadcast %cst_14 : f32 to vector<8x128xf32>
    %46 = arith.mulf %45, %44 : vector<8x128xf32>
    %47 = tpu.iota {dimensions = array<i32: 1>} : vector<8x128xi32>
    %c8_i32 = arith.constant 8 : i32
    %48 = vector.broadcast %c8_i32 : i32 to vector<8x128xi32>
    %49 = arith.cmpi slt, %47, %48 : vector<8x128xi32>
    %cst_15 = arith.constant 0.000000e+00 : f32
    %50 = vector.broadcast %cst_15 : f32 to vector<8x128xf32>
    %51 = arith.select %49, %46, %50 : vector<8x128xi1>, vector<8x128xf32>
    %52 = tpu.iota {dimensions = array<i32: 1>} : vector<1x128xi32>
    %53 = arith.sitofp %52 : vector<1x128xi32> to vector<1x128xf32>
    %54 = vector.extract_strided_slice %51 {offsets = [0, 0], sizes = [8, 1], strides = [1, 1]} : vector<8x128xf32> to vector<8x1xf32>
    %55 = vector.extract_strided_slice %51 {offsets = [0, 1], sizes = [8, 1], strides = [1, 1]} : vector<8x128xf32> to vector<8x1xf32>
    %56 = vector.extract_strided_slice %51 {offsets = [0, 2], sizes = [8, 1], strides = [1, 1]} : vector<8x128xf32> to vector<8x1xf32>
    %57 = vector.extract_strided_slice %51 {offsets = [0, 3], sizes = [8, 1], strides = [1, 1]} : vector<8x128xf32> to vector<8x1xf32>
    %58 = vector.extract_strided_slice %51 {offsets = [0, 4], sizes = [8, 1], strides = [1, 1]} : vector<8x128xf32> to vector<8x1xf32>
    %59 = vector.extract_strided_slice %51 {offsets = [0, 5], sizes = [8, 1], strides = [1, 1]} : vector<8x128xf32> to vector<8x1xf32>
    %60 = vector.extract_strided_slice %51 {offsets = [0, 6], sizes = [8, 1], strides = [1, 1]} : vector<8x128xf32> to vector<8x1xf32>
    %61 = vector.extract_strided_slice %51 {offsets = [0, 7], sizes = [8, 1], strides = [1, 1]} : vector<8x128xf32> to vector<8x1xf32>
    %62 = vector.shape_cast %54 : vector<8x1xf32> to vector<1x8x1xf32>
    %63 = vector.shape_cast %55 : vector<8x1xf32> to vector<1x8x1xf32>
    %64 = vector.shape_cast %56 : vector<8x1xf32> to vector<1x8x1xf32>
    %65 = vector.shape_cast %57 : vector<8x1xf32> to vector<1x8x1xf32>
    %66 = vector.shape_cast %58 : vector<8x1xf32> to vector<1x8x1xf32>
    %67 = vector.shape_cast %59 : vector<8x1xf32> to vector<1x8x1xf32>
    %68 = vector.shape_cast %60 : vector<8x1xf32> to vector<1x8x1xf32>
    %69 = vector.shape_cast %61 : vector<8x1xf32> to vector<1x8x1xf32>
    %70 = tpu.concatenate %62, %63, %64, %65, %66, %67, %68, %69 in 0 : vector<1x8x1xf32>, vector<1x8x1xf32>, vector<1x8x1xf32>, vector<1x8x1xf32>, vector<1x8x1xf32>, vector<1x8x1xf32>, vector<1x8x1xf32>, vector<1x8x1xf32> -> vector<8x8x1xf32>
    %71 = vector.shape_cast %53 : vector<1x128xf32> to vector<1x1x128xf32>
    %72 = vector.broadcast %71 : vector<1x1x128xf32> to vector<8x8x128xf32>
    %73 = vector.broadcast %70 : vector<8x8x1xf32> to vector<8x8x128xf32>
    %74 = arith.subf %72, %73 : vector<8x8x128xf32>
    %cst_16 = arith.constant 5.000000e-01 : f32
    %75 = vector.broadcast %cst_16 : f32 to vector<8x8x128xf32>
    %76 = arith.mulf %74, %75 : vector<8x8x128xf32>
    %cst_17 = arith.constant -5.000000e-01 : f32
    %77 = vector.broadcast %cst_17 : f32 to vector<8x8x128xf32>
    %78 = arith.mulf %77, %76 : vector<8x8x128xf32>
    %79 = arith.mulf %78, %76 : vector<8x8x128xf32>
    %80 = math.exp %79 : vector<8x8x128xf32>
    %cst_18 = arith.constant dense<0.000000e+00> : vector<8x128xf32>
    %81 = vector.multi_reduction <add>, %80, %cst_18 [0] : vector<8x8x128xf32> to vector<8x128xf32>
    %cst_19 = arith.constant 0.199471146 : f32
    %82 = vector.broadcast %cst_19 : f32 to vector<8x128xf32>
    %83 = arith.mulf %82, %81 : vector<8x128xf32>
    %c13 = arith.constant 13 : index
    %c0_20 = arith.constant 0 : index
    %84 = vector.load %arg1[%c13, %c0_20] : memref<16x384xf32, #tpu.memory_space<vmem>>, vector<1x128xf32>
    %85 = vector.broadcast %84 : vector<1x128xf32> to vector<8x128xf32>
    %86 = arith.mulf %85, %83 : vector<8x128xf32>
    %87 = arith.truncf %86 : vector<8x128xf32> to vector<8x128xbf16>
    %c0_i32_21 = arith.constant 0 : i32
    %88 = tpu.memref_slice %arg18[%c0_i32_21] : memref<7x!tpu.dma_semaphore, #tpu.memory_space<semaphore_mem>> -> memref<1x!tpu.dma_semaphore, #tpu.memory_space<semaphore_mem>>
    %89 = tpu.memref_squeeze %88 : memref<1x!tpu.dma_semaphore, #tpu.memory_space<semaphore_mem>> -> memref<!tpu.dma_semaphore, #tpu.memory_space<semaphore_mem>>
    tpu.wait_dma2 semaphore(%89 : memref<!tpu.dma_semaphore, #tpu.memory_space<semaphore_mem>>) src(%arg3 : memref<128x384xbf16, #tpu.memory_space<any>>) dst(%arg11 : memref<128x384xbf16, #tpu.memory_space<vmem>>)
    %c0_22 = arith.constant 0 : index
    %c0_23 = arith.constant 0 : index
    %90 = vector.load %arg11[%c0_22, %c0_23] : memref<128x384xbf16, #tpu.memory_space<vmem>>, vector<128x384xbf16>
    %cst_24 = arith.constant dense<0.000000e+00> : vector<8x384xf32>
    %91 = tpu.matmul %87, %90, %cst_24 {dimension_numbers = #tpu.dot_dimension_numbers<[1], [0], [0], [1], [0, 0, 1, 1], [], []>} : vector<8x128xbf16>, vector<128x384xbf16>, vector<8x384xf32> -> vector<8x384xf32>
    %c3 = arith.constant 3 : index
    %c0_25 = arith.constant 0 : index
    %92 = vector.load %arg1[%c3, %c0_25] : memref<16x384xf32, #tpu.memory_space<vmem>>, vector<1x384xf32>
    %93 = vector.broadcast %92 : vector<1x384xf32> to vector<8x384xf32>
    %94 = arith.addf %91, %93 : vector<8x384xf32>
    %cst_26 = arith.constant 0.000000e+00 : f32
    %95 = vector.broadcast %cst_26 : f32 to vector<8x384xf32>
    %96 = arith.maximumf %94, %95 : vector<8x384xf32>
    %97 = arith.truncf %96 : vector<8x384xf32> to vector<8x384xbf16>
    %c1_i32_27 = arith.constant 1 : i32
    %98 = tpu.memref_slice %arg18[%c1_i32_27] : memref<7x!tpu.dma_semaphore, #tpu.memory_space<semaphore_mem>> -> memref<1x!tpu.dma_semaphore, #tpu.memory_space<semaphore_mem>>
    %99 = tpu.memref_squeeze %98 : memref<1x!tpu.dma_semaphore, #tpu.memory_space<semaphore_mem>> -> memref<!tpu.dma_semaphore, #tpu.memory_space<semaphore_mem>>
    tpu.wait_dma2 semaphore(%99 : memref<!tpu.dma_semaphore, #tpu.memory_space<semaphore_mem>>) src(%arg4 : memref<384x256xbf16, #tpu.memory_space<any>>) dst(%arg12 : memref<384x256xbf16, #tpu.memory_space<vmem>>)
    %c0_28 = arith.constant 0 : index
    %c0_29 = arith.constant 0 : index
    %100 = vector.load %arg12[%c0_28, %c0_29] : memref<384x256xbf16, #tpu.memory_space<vmem>>, vector<384x256xbf16>
    %cst_30 = arith.constant dense<0.000000e+00> : vector<8x256xf32>
    %101 = tpu.matmul %97, %100, %cst_30 {dimension_numbers = #tpu.dot_dimension_numbers<[1], [0], [0], [1], [0, 0, 1, 1], [], []>} : vector<8x384xbf16>, vector<384x256xbf16>, vector<8x256xf32> -> vector<8x256xf32>
    %c4 = arith.constant 4 : index
    %c0_31 = arith.constant 0 : index
    %102 = vector.load %arg1[%c4, %c0_31] : memref<16x384xf32, #tpu.memory_space<vmem>>, vector<1x256xf32>
    %103 = vector.broadcast %102 : vector<1x256xf32> to vector<8x256xf32>
    %104 = arith.addf %101, %103 : vector<8x256xf32>
    %cst_32 = arith.constant 0.000000e+00 : f32
    %105 = vector.broadcast %cst_32 : f32 to vector<8x256xf32>
    %106 = arith.maximumf %104, %105 : vector<8x256xf32>
    %107 = arith.truncf %106 : vector<8x256xf32> to vector<8x256xbf16>
    %c2_i32_33 = arith.constant 2 : i32
    %108 = tpu.memref_slice %arg18[%c2_i32_33] : memref<7x!tpu.dma_semaphore, #tpu.memory_space<semaphore_mem>> -> memref<1x!tpu.dma_semaphore, #tpu.memory_space<semaphore_mem>>
    %109 = tpu.memref_squeeze %108 : memref<1x!tpu.dma_semaphore, #tpu.memory_space<semaphore_mem>> -> memref<!tpu.dma_semaphore, #tpu.memory_space<semaphore_mem>>
    tpu.wait_dma2 semaphore(%109 : memref<!tpu.dma_semaphore, #tpu.memory_space<semaphore_mem>>) src(%arg5 : memref<384x128xbf16, #tpu.memory_space<any>>) dst(%arg13 : memref<384x128xbf16, #tpu.memory_space<vmem>>)
    %c0_34 = arith.constant 0 : index
    %c0_35 = arith.constant 0 : index
    %110 = vector.load %arg13[%c0_34, %c0_35] : memref<384x128xbf16, #tpu.memory_space<vmem>>, vector<256x128xbf16>
    %cst_36 = arith.constant dense<0.000000e+00> : vector<8x128xf32>
    %111 = tpu.matmul %107, %110, %cst_36 {dimension_numbers = #tpu.dot_dimension_numbers<[1], [0], [0], [1], [0, 0, 1, 1], [], []>} : vector<8x256xbf16>, vector<256x128xbf16>, vector<8x128xf32> -> vector<8x128xf32>
    %c5 = arith.constant 5 : index
    %c0_37 = arith.constant 0 : index
    %112 = vector.load %arg1[%c5, %c0_37] : memref<16x384xf32, #tpu.memory_space<vmem>>, vector<1x128xf32>
    %113 = vector.broadcast %112 : vector<1x128xf32> to vector<8x128xf32>
    %114 = arith.addf %111, %113 : vector<8x128xf32>
    %cst_38 = arith.constant 0.000000e+00 : f32
    %115 = vector.broadcast %cst_38 : f32 to vector<8x128xf32>
    %116 = arith.maximumf %114, %115 : vector<8x128xf32>
    %117 = arith.truncf %116 : vector<8x128xf32> to vector<8x128xbf16>
    %c256_39 = arith.constant 256 : index
    %c0_40 = arith.constant 0 : index
    %118 = vector.load %arg13[%c256_39, %c0_40] : memref<384x128xbf16, #tpu.memory_space<vmem>>, vector<128x128xbf16>
    %cst_41 = arith.constant dense<0.000000e+00> : vector<8x128xf32>
    %119 = tpu.matmul %117, %118, %cst_41 {dimension_numbers = #tpu.dot_dimension_numbers<[1], [0], [0], [1], [0, 0, 1, 1], [], []>} : vector<8x128xbf16>, vector<128x128xbf16>, vector<8x128xf32> -> vector<8x128xf32>
    %c6 = arith.constant 6 : index
    %c0_42 = arith.constant 0 : index
    %120 = vector.load %arg1[%c6, %c0_42] : memref<16x384xf32, #tpu.memory_space<vmem>>, vector<1x128xf32>
    %121 = vector.broadcast %120 : vector<1x128xf32> to vector<8x128xf32>
    %122 = arith.addf %119, %121 : vector<8x128xf32>
    %123 = vector.extract_strided_slice %122 {offsets = [0, 0], sizes = [8, 16], strides = [1, 1]} : vector<8x128xf32> to vector<8x16xf32>
    %124 = arith.truncf %123 : vector<8x16xf32> to vector<8x16xbf16>
    %c3_i32_43 = arith.constant 3 : i32
    %125 = tpu.memref_slice %arg18[%c3_i32_43] : memref<7x!tpu.dma_semaphore, #tpu.memory_space<semaphore_mem>> -> memref<1x!tpu.dma_semaphore, #tpu.memory_space<semaphore_mem>>
    %126 = tpu.memref_squeeze %125 : memref<1x!tpu.dma_semaphore, #tpu.memory_space<semaphore_mem>> -> memref<!tpu.dma_semaphore, #tpu.memory_space<semaphore_mem>>
    tpu.wait_dma2 semaphore(%126 : memref<!tpu.dma_semaphore, #tpu.memory_space<semaphore_mem>>) src(%arg6 : memref<16x256xbf16, #tpu.memory_space<any>>) dst(%arg14 : memref<16x256xbf16, #tpu.memory_space<vmem>>)
    %c0_44 = arith.constant 0 : index
    %c0_45 = arith.constant 0 : index
    %127 = vector.load %arg14[%c0_44, %c0_45] : memref<16x256xbf16, #tpu.memory_space<vmem>>, vector<16x128xbf16>
    %cst_46 = arith.constant dense<0.000000e+00> : vector<8x128xf32>
    %128 = tpu.matmul %124, %127, %cst_46 {dimension_numbers = #tpu.dot_dimension_numbers<[1], [0], [0], [1], [0, 0, 1, 1], [], []>} : vector<8x16xbf16>, vector<16x128xbf16>, vector<8x128xf32> -> vector<8x128xf32>
    %c7 = arith.constant 7 : index
    %c0_47 = arith.constant 0 : index
    %129 = vector.load %arg1[%c7, %c0_47] : memref<16x384xf32, #tpu.memory_space<vmem>>, vector<1x128xf32>
    %130 = vector.broadcast %129 : vector<1x128xf32> to vector<8x128xf32>
    %131 = arith.addf %128, %130 : vector<8x128xf32>
    %c8_i32_48 = arith.constant 8 : i32
    %132 = tpu.dynamic_rotate %14 by %c8_i32_48 dim 1 : vector<8x128xf32>, i32 -> vector<8x128xf32>
    %133 = arith.addf %131, %132 : vector<8x128xf32>
    %134 = vector.extract_strided_slice %133 {offsets = [0, 0], sizes = [8, 16], strides = [1, 1]} : vector<8x128xf32> to vector<8x16xf32>
    %135 = arith.truncf %134 : vector<8x16xf32> to vector<8x16xbf16>
    %c0_49 = arith.constant 0 : index
    %c128_50 = arith.constant 128 : index
    %136 = vector.load %arg14[%c0_49, %c128_50] : memref<16x256xbf16, #tpu.memory_space<vmem>>, vector<16x128xbf16>
    %cst_51 = arith.constant dense<0.000000e+00> : vector<8x128xf32>
    %137 = tpu.matmul %135, %136, %cst_51 {dimension_numbers = #tpu.dot_dimension_numbers<[1], [0], [0], [1], [0, 0, 1, 1], [], []>} : vector<8x16xbf16>, vector<16x128xbf16>, vector<8x128xf32> -> vector<8x128xf32>
    %c8 = arith.constant 8 : index
    %c0_52 = arith.constant 0 : index
    %138 = vector.load %arg1[%c8, %c0_52] : memref<16x384xf32, #tpu.memory_space<vmem>>, vector<1x128xf32>
    %139 = vector.broadcast %138 : vector<1x128xf32> to vector<8x128xf32>
    %140 = arith.addf %137, %139 : vector<8x128xf32>
    %cst_53 = arith.constant 0.000000e+00 : f32
    %141 = vector.broadcast %cst_53 : f32 to vector<8x128xf32>
    %142 = arith.maximumf %140, %141 : vector<8x128xf32>
    %143 = arith.truncf %142 : vector<8x128xf32> to vector<8x128xbf16>
    %c4_i32_54 = arith.constant 4 : i32
    %144 = tpu.memref_slice %arg18[%c4_i32_54] : memref<7x!tpu.dma_semaphore, #tpu.memory_space<semaphore_mem>> -> memref<1x!tpu.dma_semaphore, #tpu.memory_space<semaphore_mem>>
    %145 = tpu.memref_squeeze %144 : memref<1x!tpu.dma_semaphore, #tpu.memory_space<semaphore_mem>> -> memref<!tpu.dma_semaphore, #tpu.memory_space<semaphore_mem>>
    tpu.wait_dma2 semaphore(%145 : memref<!tpu.dma_semaphore, #tpu.memory_space<semaphore_mem>>) src(%arg7 : memref<128x256xbf16, #tpu.memory_space<any>>) dst(%arg15 : memref<128x256xbf16, #tpu.memory_space<vmem>>)
    %c0_55 = arith.constant 0 : index
    %c0_56 = arith.constant 0 : index
    %146 = vector.load %arg15[%c0_55, %c0_56] : memref<128x256xbf16, #tpu.memory_space<vmem>>, vector<128x256xbf16>
    %cst_57 = arith.constant dense<0.000000e+00> : vector<8x256xf32>
    %147 = tpu.matmul %143, %146, %cst_57 {dimension_numbers = #tpu.dot_dimension_numbers<[1], [0], [0], [1], [0, 0, 1, 1], [], []>} : vector<8x128xbf16>, vector<128x256xbf16>, vector<8x256xf32> -> vector<8x256xf32>
    %c9 = arith.constant 9 : index
    %c0_58 = arith.constant 0 : index
    %148 = vector.load %arg1[%c9, %c0_58] : memref<16x384xf32, #tpu.memory_space<vmem>>, vector<1x256xf32>
    %149 = vector.broadcast %148 : vector<1x256xf32> to vector<8x256xf32>
    %150 = arith.addf %147, %149 : vector<8x256xf32>
    %cst_59 = arith.constant 0.000000e+00 : f32
    %151 = vector.broadcast %cst_59 : f32 to vector<8x256xf32>
    %152 = arith.maximumf %150, %151 : vector<8x256xf32>
    %153 = arith.truncf %152 : vector<8x256xf32> to vector<8x256xbf16>
    %c5_i32_60 = arith.constant 5 : i32
    %154 = tpu.memref_slice %arg18[%c5_i32_60] : memref<7x!tpu.dma_semaphore, #tpu.memory_space<semaphore_mem>> -> memref<1x!tpu.dma_semaphore, #tpu.memory_space<semaphore_mem>>
    %155 = tpu.memref_squeeze %154 : memref<1x!tpu.dma_semaphore, #tpu.memory_space<semaphore_mem>> -> memref<!tpu.dma_semaphore, #tpu.memory_space<semaphore_mem>>
    tpu.wait_dma2 semaphore(%155 : memref<!tpu.dma_semaphore, #tpu.memory_space<semaphore_mem>>) src(%arg8 : memref<256x384xbf16, #tpu.memory_space<any>>) dst(%arg16 : memref<256x384xbf16, #tpu.memory_space<vmem>>)
    %c0_61 = arith.constant 0 : index
    %c0_62 = arith.constant 0 : index
    %156 = vector.load %arg16[%c0_61, %c0_62] : memref<256x384xbf16, #tpu.memory_space<vmem>>, vector<256x384xbf16>
    %cst_63 = arith.constant dense<0.000000e+00> : vector<8x384xf32>
    %157 = tpu.matmul %153, %156, %cst_63 {dimension_numbers = #tpu.dot_dimension_numbers<[1], [0], [0], [1], [0, 0, 1, 1], [], []>} : vector<8x256xbf16>, vector<256x384xbf16>, vector<8x384xf32> -> vector<8x384xf32>
    %c10 = arith.constant 10 : index
    %c0_64 = arith.constant 0 : index
    %158 = vector.load %arg1[%c10, %c0_64] : memref<16x384xf32, #tpu.memory_space<vmem>>, vector<1x384xf32>
    %159 = vector.broadcast %158 : vector<1x384xf32> to vector<8x384xf32>
    %160 = arith.addf %157, %159 : vector<8x384xf32>
    %cst_65 = arith.constant 0.000000e+00 : f32
    %161 = vector.broadcast %cst_65 : f32 to vector<8x384xf32>
    %162 = arith.maximumf %160, %161 : vector<8x384xf32>
    %163 = arith.truncf %162 : vector<8x384xf32> to vector<8x384xbf16>
    %c6_i32_66 = arith.constant 6 : i32
    %164 = tpu.memref_slice %arg18[%c6_i32_66] : memref<7x!tpu.dma_semaphore, #tpu.memory_space<semaphore_mem>> -> memref<1x!tpu.dma_semaphore, #tpu.memory_space<semaphore_mem>>
    %165 = tpu.memref_squeeze %164 : memref<1x!tpu.dma_semaphore, #tpu.memory_space<semaphore_mem>> -> memref<!tpu.dma_semaphore, #tpu.memory_space<semaphore_mem>>
    tpu.wait_dma2 semaphore(%165 : memref<!tpu.dma_semaphore, #tpu.memory_space<semaphore_mem>>) src(%arg9 : memref<512x128xbf16, #tpu.memory_space<any>>) dst(%arg17 : memref<512x128xbf16, #tpu.memory_space<vmem>>)
    %c0_67 = arith.constant 0 : index
    %c0_68 = arith.constant 0 : index
    %166 = vector.load %arg17[%c0_67, %c0_68] : memref<512x128xbf16, #tpu.memory_space<vmem>>, vector<384x128xbf16>
    %cst_69 = arith.constant dense<0.000000e+00> : vector<8x128xf32>
    %167 = tpu.matmul %163, %166, %cst_69 {dimension_numbers = #tpu.dot_dimension_numbers<[1], [0], [0], [1], [0, 0, 1, 1], [], []>} : vector<8x384xbf16>, vector<384x128xbf16>, vector<8x128xf32> -> vector<8x128xf32>
    %c11 = arith.constant 11 : index
    %c0_70 = arith.constant 0 : index
    %168 = vector.load %arg1[%c11, %c0_70] : memref<16x384xf32, #tpu.memory_space<vmem>>, vector<1x128xf32>
    %169 = vector.broadcast %168 : vector<1x128xf32> to vector<8x128xf32>
    %170 = arith.addf %167, %169 : vector<8x128xf32>
    %171 = arith.truncf %170 : vector<8x128xf32> to vector<8x128xbf16>
    %c384 = arith.constant 384 : index
    %c0_71 = arith.constant 0 : index
    %172 = vector.load %arg17[%c384, %c0_71] : memref<512x128xbf16, #tpu.memory_space<vmem>>, vector<128x128xbf16>
    %cst_72 = arith.constant dense<0.000000e+00> : vector<8x128xf32>
    %173 = tpu.matmul %171, %172, %cst_72 {dimension_numbers = #tpu.dot_dimension_numbers<[1], [0], [0], [1], [0, 0, 1, 1], [], []>} : vector<8x128xbf16>, vector<128x128xbf16>, vector<8x128xf32> -> vector<8x128xf32>
    %c12 = arith.constant 12 : index
    %c0_73 = arith.constant 0 : index
    %174 = vector.load %arg1[%c12, %c0_73] : memref<16x384xf32, #tpu.memory_space<vmem>>, vector<1x128xf32>
    %175 = vector.broadcast %174 : vector<1x128xf32> to vector<8x128xf32>
    %176 = arith.addf %173, %175 : vector<8x128xf32>
    %c64_i32 = arith.constant 64 : i32
    %177 = tpu.dynamic_rotate %51 by %c64_i32 dim 1 : vector<8x128xf32>, i32 -> vector<8x128xf32>
    %178 = arith.addf %176, %177 : vector<8x128xf32>
    %c0_74 = arith.constant 0 : index
    %c0_75 = arith.constant 0 : index
    %179 = vector.load %arg10[%c0_74, %c0_75] : memref<8x128xf32, #tpu.memory_space<vmem>>, vector<8x128xf32>
    tpu.vector_store %arg10[%c0_74, %c0_75], %178 {strides = array<i32>} : memref<8x128xf32, #tpu.memory_space<vmem>>, vector<8x128xf32>,
    return
  }
}

</mosaic_0001>

<bundles_post_ra>
// kernel: _decoder_v2_call.1
= control target key start
LH: loop header
LB: loop body
LE: loop exit
PB: predicated region body
PF: predicated region fallthrough
CT: control target
= control target key end

     0   :  { %15 = vsyncpa [#allocation11], 0  ;;  %s2278_s0 = inlined_call_operand.vmem [shape: f32[8,128], index: 0, kind: input, shape index: {}]   ;;  %s2279_s1 = inlined_call_operand.hbm [shape: f32[16,384], index: 1, kind: input, shape index: {}]   ;;  %s2280_s2 = inlined_call_operand.hbm [shape: bf16[16,384], index: 2, kind: input, shape index: {}]   ;;  %s2281_s3 = inlined_call_operand.hbm [shape: bf16[128,384], index: 3, kind: input, shape index: {}]   ;;  %s2282_s4 = inlined_call_operand.hbm [shape: bf16[384,256], index: 4, kind: input, shape index: {}]   ;;  %s2283_s5 = inlined_call_operand.hbm [shape: bf16[384,128], index: 5, kind: input, shape index: {}]   ;;  %s2284_s6 = inlined_call_operand.vmem [shape: bf16[16,256], index: 6, kind: input, shape index: {}]   ;;  %s2285_s7 = inlined_call_operand.hbm [shape: bf16[128,256], index: 7, kind: input, shape index: {}]   ;;  %s2286_s8 = inlined_call_operand.hbm [shape: bf16[256,384], index: 8, kind: input, shape index: {}]   ;;  %s2287_s9 = inlined_call_operand.hbm [shape: bf16[512,128], index: 9, kind: input, shape index: {}]   ;;  %s2288_s10 = inlined_call_operand.vmem [shape: f32[8,128], index: 10, kind: output, shape index: {}]  }
   0x1   :  { %16 = vsyncpa [#allocation13], 0  ;;  %s1941_s13 = smov [#allocation10]   ;;  %s1835_s17 = scalar_lea.hbm %s2279_s1, 768 }
   0x2   :  { %s24_s14 = sshll.u32 %s1941_s13, 4  ;;  %p1836_p0 = scmp.ne.s32.totalorder %s2279_s1, %s1835_s17  ;;  %s25_s14 = int_to_ptr.vmem [resolvable:$true] %s24_s14 }
   0x3   :  { %p1839_p1 = scmp.lt.u32.totalorder %s1835_s17, %s2279_s1 }
   0x5   :  { %p1841_p2 = pnand %p1839_p1, %p1836_p0 }
   0x7   :  { %1844 = shalt.err (!%p1841_p2)
}
   0x8   :  { %s1845_s22 = scalar_lea.vmem %s25_s14, 768  ;;  %p1850_p4 = scmp.lt.s32.totalorder %s25_s14, %s25_s14 }
   0x9   :  { %p1846_p3 = scmp.ne.s32.totalorder %s25_s14, %s1845_s22  ;;  %p1851_p5 = scmp.lt.s32.totalorder %s1845_s22, %s1845_s22 }
   0xb   :  { %p1852_p6 = por %p1851_p5, %p1850_p4 }
   0xd   :  { %p1853_p7 = pnand %p1852_p6, %p1846_p3 }
   0xf   :  { %1856 = shalt.err (!%p1853_p7)
}
  0x10   :  { %s1942_s23 = smov 384   ;;  %s1943_s24 = smov 24  }
  0x11   :  { %30 = dma.hbm_to_vmem [thread:$0]  %s2279_s1, 768, %s25_s14, [#allocation11], %s1942_s23, %s1942_s23, %s1943_s24  }
  0x12   :  { %s1944_s27 = smov [#allocation12]   ;;  %s1857_s11 = scalar_lea.hbm %s2280_s2, 384 }
  0x13   :  { %s36_s28 = sshll.u32 %s1944_s27, 4  ;;  %p1858_p8 = scmp.ne.s32.totalorder %s2280_s2, %s1857_s11  ;;  %s37_s28 = int_to_ptr.vmem [resolvable:$true] %s36_s28 }
  0x14   :  { %p1861_p9 = scmp.lt.u32.totalorder %s1857_s11, %s2280_s2 }
  0x16   :  { %p1863_p10 = pnand %p1861_p9, %p1858_p8 }
  0x18   :  { %1866 = shalt.err (!%p1863_p10)
}
  0x19   :  { %s1867_s17 = scalar_lea.vmem %s37_s28, 384  ;;  %p1872_p12 = scmp.lt.s32.totalorder %s37_s28, %s37_s28 }
  0x1a   :  { %p1868_p11 = scmp.ne.s32.totalorder %s37_s28, %s1867_s17  ;;  %p1873_p13 = scmp.lt.s32.totalorder %s1867_s17, %s1867_s17 }
  0x1c   :  { %p1874_p0 = por %p1873_p13, %p1872_p12 }
  0x1e   :  { %p1875_p1 = pnand %p1874_p0, %p1868_p11 }
  0x20   :  { %1878 = shalt.err (!%p1875_p1)
}
  0x21   :  { %s1945_s1 = smov 192   ;;  %s1946_s14 = smov 12  }
  0x22   :  { %42 = dma.hbm_to_vmem [thread:$0]  %s2280_s2, 384, %s37_s28, [#allocation13], %s1945_s1, %s1945_s1, %s1946_s14  }
  0x23   :  { %1923 = dma.done.wait [#allocation11], 768  }
  0x24   :  { %1924 = vsyncadd [#allocation11], 4294966528 }
  0x25   :  { %1925 = dma.done.wait [#allocation13], 384  }
  0x26   :  { %1926 = vsyncadd [#allocation13], 4294966912  ;;  %s54_s20 = sld [smem:[#allocation0]]   ;;  %66 = sst [smem:[#allocation15]] %s1942_s23 }
  0x27   :  { %68 = sst [smem:[#allocation15 + $0x1]] %s1942_s23  ;;  %s1947_s21 = smov [#allocation2]  }
  0x28   :  { %s62_s22 = sshll.u32 %s1947_s21, 4  ;;  %s1948_s24 = smov 3   ;;  %s63_s22 = int_to_ptr.vmem [resolvable:$true] %s62_s22 }
  0x29   :  { %70 = sst [smem:[#allocation15 + $0x2]] %s1948_s24  ;;  %s1949_s25 = smov 64  }
  0x2a   :  { %78 = sst [smem:[#allocation15 + $0x6]] %s1945_s1  ;;  %s1950_s2 = smov 128  }
  0x2b   :  { %72 = sst [smem:[#allocation15 + $0x3]] %s1949_s25  ;;  %s1951_s27 = smov 2  }
  0x2c   :  { %74 = sst [smem:[#allocation15 + $0x4]] %s1950_s2  ;;  %s1521_s26 = sshll.u32 %s54_s20, 26 }
  0x2d   :  { %76 = sst [smem:[#allocation15 + $0x5]] %s1951_s27  ;;  %s2068_s28 = sadd.s32 134217728, %s1521_s26 }
  0x2e   :  { %80 = sst [smem:[#allocation15 + $0x7]] %s1949_s25  ;;  %s1952_s29 = smov 4  }
  0x2f   :  { %82 = sst [smem:[#allocation15 + $0x8]] %s1952_s29  ;;  %s1953_s30 = smov [#allocation9]  }
  0x30   :  { %s1954_s11 = smov [#allocation14]   ;;  %s1955_s15 = smov 256  }
  0x31   :  { %84 = dma.general %s2281_s3, 3072, %s63_s22, %s1953_s30, %s1954_s11, [#allocation15], %s2068_s28, 0  }
  0x32   :  { %105 = sst [smem:[#allocation17 + $0x2]] %s1951_s27  ;;  %s1956_s16 = smov [#allocation3]  }
  0x33   :  { %101 = sst [smem:[#allocation17]] %s1955_s15  ;;  %s97_s17 = sshll.u32 %s1956_s16, 4  ;;  %s98_s17 = int_to_ptr.vmem [resolvable:$true] %s97_s17 }
  0x34   :  { %103 = sst [smem:[#allocation17 + $0x1]] %s1955_s15  ;;  %s1957_s3 = smov [#allocation4]  }
  0x35   :  { %107 = sst [smem:[#allocation17 + $0x3]] %s1949_s25  ;;  %s128_s14 = sshll.u32 %s1957_s3, 4  ;;  %s129_s14 = int_to_ptr.vmem [resolvable:$true] %s128_s14 }
  0x36   :  { %109 = sst [smem:[#allocation17 + $0x4]] %s1950_s2  ;;  %s1958_s18 = smov [#allocation9 + $0x1]  }
  0x37   :  { %111 = sst [smem:[#allocation17 + $0x5]] %s1951_s27  ;;  %s1959_s19 = smov [#allocation16]  }
  0x38   :  { %113 = sst [smem:[#allocation17 + $0x6]] %s1950_s2  ;;  %s1879_s30 = scalar_lea.hbm %s2283_s5, 3072 }
  0x39   :  { %115 = sst [smem:[#allocation17 + $0x7]] %s1949_s25  ;;  %p1880_p2 = scmp.ne.s32.totalorder %s2283_s5, %s1879_s30 }
  0x3a   :  { %117 = sst [smem:[#allocation17 + $0x8]] %s1952_s29  ;;  %p1883_p3 = scmp.lt.u32.totalorder %s1879_s30, %s2283_s5 }
  0x3b   :  { %119 = dma.general %s2282_s4, 6144, %s98_s17, %s1958_s18, %s1959_s19, [#allocation17], %s2068_s28, 0  }
  0x3c   :  { %p1885_p4 = pnand %p1883_p3, %p1880_p2 }
  0x3e   :  { %1888 = shalt.err (!%p1885_p4)  }
  0x3f   :  { %s1889_s3 = scalar_lea.vmem %s129_s14, 3072  ;;  %p1894_p6 = scmp.lt.s32.totalorder %s129_s14, %s129_s14 }
  0x40   :  { %p1890_p5 = scmp.ne.s32.totalorder %s129_s14, %s1889_s3  ;;  %p1895_p7 = scmp.lt.s32.totalorder %s1889_s3, %s1889_s3 }
  0x42   :  { %p1896_p8 = por %p1895_p7, %p1894_p6 }
  0x44   :  { %p1897_p9 = pnand %p1896_p8, %p1890_p5 }
  0x46   :  { %1900 = shalt.err (!%p1897_p9)  }
  0x47   :  { %131 = dma.hbm_to_vmem [thread:$0]  %s2283_s5, 3072, %s129_s14, [#allocation9 + $0x2]  ;;  %v150_v0 = vld [vmem:[%s2284_s6] sm:$0xf]  ;;  %v152_v1 = vld [vmem:[%s2284_s6 + $0x8] sm:$0xf] }
  0x48   :  { %v154_v2 = vld [vmem:[%s2284_s6 + $0x4] sm:$0xf]  ;;  %151 = vst [vmem:[#allocation5] sm:$0xf] %v150_v0  ;;  %153 = vst [vmem:[#allocation5 + $0x4] sm:$0xf] %v152_v1 }
  0x49   :  { %155 = vst [vmem:[#allocation5 + $0x8] sm:$0xf] %v154_v2  ;;  %v156_v3 = vld [vmem:[%s2284_s6 + $0xc] sm:$0xf] }
  0x4a   :  { %157 = vst [vmem:[#allocation5 + $0xc] sm:$0xf] %v156_v3 }
  0x4b   :  { %196 = vsyncadd [#allocation9 + $0x3], 256  ;;  %213 = sst [smem:[#allocation24]] %s1955_s15  ;;  %s1960_s5 = smov [#allocation6]   ;;  %v1961_v4 = vmov 0.0   ;;  %vm1962_vm0 = vmmov 0   ;;  %v449_v36 = vlaneseq }
  0x4c   :  { %s209_s14 = sshll.u32 %s1960_s5, 4  ;;  %215 = sst [smem:[#allocation24 + $0x1]] %s1955_s15  ;;  %1657 = vmatprep.subr.bf16.mxu1 %v1961_v4  ;;  %1659 = vmatprep.mubr.msk.bf16.mxu1 %vm1962_vm0, %v1961_v4  ;;  %vm290_vm1 = vcmask 130048   ;;  %v1968_v26 = vmov 0   ;;  %s210_s14 = int_to_ptr.vmem [resolvable:$true] %s209_s14 }
  0x4d   :  { %217 = sst [smem:[#allocation24 + $0x2]] %s1951_s27  ;;  %1669 = vmatprep.subr.bf16.mxu0 %v1961_v4  ;;  %1671 = vmatprep.mubr.msk.bf16.mxu0 %vm1962_vm0, %v1961_v4  ;;  %s1963_s6 = smov [#allocation9 + $0x4]   ;;  %v450_v37 = vand.u32 127, %v449_v36 }
  0x4e   :  { %219 = sst [smem:[#allocation24 + $0x3]] %s1949_s25  ;;  %s1964_s15 = smov [#allocation23]   ;;  %1810 = vset.pattern.permute.xlu1 %v1968_v26  ;;  %1811 = vset.pattern.permute.xlu0 %v1968_v26 }
  0x4f   :  { %221 = sst [smem:[#allocation24 + $0x4]] %s1950_s2  ;;  %s1965_s16 = smov [#allocation7]   ;;  %vm451_vm2 = vcmp.lt.s32.totalorder %v450_v37, 8 }
  0x50   :  { %223 = sst [smem:[#allocation24 + $0x5]] %s1951_s27  ;;  %s244_s3 = sshll.u32 %s1965_s16, 4  ;;  %s245_s3 = int_to_ptr.vmem [resolvable:$true] %s244_s3 }
  0x51   :  { %225 = sst [smem:[#allocation24 + $0x6]] %s1950_s2  ;;  %s1967_s4 = smov [#allocation25]  }
  0x52   :  { %227 = sst [smem:[#allocation24 + $0x7]] %s1949_s25  ;;  %s1976_s19 = smov [#allocation8]  }
  0x53   :  { %229 = sst [smem:[#allocation24 + $0x8]] %s1952_s29  ;;  %s275_s20 = sshll.u32 %s1976_s19, 4  ;;  %s276_s20 = int_to_ptr.vmem [resolvable:$true] %s275_s20 }
  0x54   :  { %231 = dma.general %s2285_s7, 2048, %s210_s14, %s1963_s6, %s1964_s15, [#allocation24], %s2068_s28, 0  }
  0x55   :  { %248 = sst [smem:[#allocation26]] %s1942_s23  ;;  %s1966_s7 = smov [#allocation9 + $0x5]  }
  0x56   :  { %250 = sst [smem:[#allocation26 + $0x1]] %s1942_s23  ;;  %s1901_s26 = scalar_lea.hbm %s2287_s9, 4096 }
  0x57   :  { %252 = sst [smem:[#allocation26 + $0x2]] %s1948_s24  ;;  %p1902_p10 = scmp.ne.s32.totalorder %s2287_s9, %s1901_s26 }
  0x58   :  { %254 = sst [smem:[#allocation26 + $0x3]] %s1949_s25  ;;  %p1905_p11 = scmp.lt.u32.totalorder %s1901_s26, %s2287_s9 }
  0x59   :  { %256 = sst [smem:[#allocation26 + $0x4]] %s1950_s2  ;;  %s1972_s2 = smov 126  }
  0x5a   :  { %258 = sst [smem:[#allocation26 + $0x5]] %s1951_s27  ;;  %s1973_s27 = smov 122  }
  0x5b   :  { %260 = sst [smem:[#allocation26 + $0x6]] %s1945_s1  ;;  %s1971_s1 = smov 124  }
  0x5c   :  { %262 = sst [smem:[#allocation26 + $0x7]] %s1949_s25  ;;  %p1907_p12 = pnand %p1905_p11, %p1902_p10 }
  0x5d   :  { %264 = sst [smem:[#allocation26 + $0x8]] %s1952_s29  ;;  %s1975_s29 = smov 121  }
  0x5e   :  { %266 = dma.general %s2286_s8, 6144, %s245_s3, %s1966_s7, %s1967_s4, [#allocation26], %s2068_s28, 0  }
  0x5f   :  { %v1812_v5 = vld [vmem:[#allocation12] ss:$12 sps:$4 sm:$0xff]   ;;  %v2148_v6 = vld [vmem:[%s2278_s0] sm:$0xff]  ;;  %s1969_s0 = smov 125   ;;  %s1970_s8 = smov 127  }
  0x60   :  { %1658 = vmatpush3.bf16.msra.mxu1 %v1812_v5  ;;  %v280_v7 = vpack.c.bf16 %v2148_v6, %v2148_v6  ;;  %v1813_v8 = vld [vmem:[#allocation12 + $0x4] ss:$12 sps:$4 sm:$0xff]   ;;  %v1814_v17 = vld [vmem:[#allocation12 + $0x8] ss:$12 sps:$4 sm:$0xff]   ;;  %s1974_s28 = smov 123  }
  0x61   :  { %1663 = vmatprep.subr.bf16.mxu1 %v1961_v4  ;;  %v283_v9 = vld [vmem:[#allocation10] ss:$0 sm:$0xff]  ;;  %1670 = vmatpush3.bf16.msra.mxu0 %v1814_v17  ;;  %v338_v18 = vld [vmem:[#allocation10 + $0x1] ss:$0 sm:$0xff]  ;;  %v392_v27 = vld [vmem:[#allocation10 + $0x2] ss:$0 sm:$0xff] }
  0x63   :  { %1660 = vmatmul.mubr.msk.bf16.vlgmr.msra.gmra.mrb[0].mxu1 %vm290_vm1, %v280_v7 }
  0x64   :  { %1664 = vmatpush3.bf16.msra.mxu1 %v1813_v8  ;;  %1665 = vmatprep.mubr.msk.bf16.mxu1 %vm1962_vm0, %v1961_v4 }
 0x136   :  { %v328_v10 = vpop.f32.mrb[0].mxu1 }
 0x137   :  { %v329_v11 = vadd.f32 %v328_v10, %v283_v9  ;;  %v1661_v12 = vpop.f32.mrb[1].mxu1 }
 0x138   :  { %v331_v13 = vpop.f32.mrb[2].mxu1 }
 0x139   :  { %v334_v14 = vmax.f32 %v329_v11, 0.0  ;;  %v1662_v15 = vpop.f32.mrb[3].mxu1 }
 0x13b   :  { %v335_v16 = vpack.c.bf16 %v334_v14, %v334_v14 }
 0x13d   :  { %1666 = vmatmul.mubr.msk.bf16.vlgmr.msra.gmra.mrb[4].mxu1 %vm290_vm1, %v335_v16 }
 0x210   :  { %v382_v19 = vpop.f32.mrb[4].mxu1 }
 0x211   :  { %v383_v20 = vadd.f32 %v382_v19, %v338_v18  ;;  %v1667_v21 = vpop.f32.mrb[5].mxu1 }
 0x212   :  { %v385_v22 = vpop.f32.mrb[6].mxu1 }
 0x213   :  { %v388_v23 = vmax.f32 %v383_v20, 0.0  ;;  %v1668_v24 = vpop.f32.mrb[7].mxu1 }
 0x215   :  { %v389_v25 = vpack.c.bf16 %v388_v23, %v388_v23 }
 0x217   :  { %1672 = vmatmul.mubr.msk.bf16.vlgmr.msra.gmra.mrb[0].mxu0 %vm290_vm1, %v389_v25 }
 0x2ea   :  { %v436_v28 = vpop.f32.mrb[0].mxu0 }
 0x2eb   :  { %v437_v29 = vadd.f32 %v436_v28, %v392_v27  ;;  %v1673_v30 = vpop.f32.mrb[1].mxu0 }
 0x2ec   :  { %v439_v31 = vpop.f32.mrb[2].mxu0 }
 0x2ed   :  { %v1535_v32 = vmul.f32 -1.442695, %v437_v29  ;;  %v1674_v33 = vpop.f32.mrb[3].mxu0 }
 0x2ef   :  { %1815 = vpow2.f32 %v1535_v32 }
 0x2f9   :  { %v1816_v34 = vpop.eup %1815 }
 0x2fa   :  { %v445_v35 = vadd.f32 1.0, %v1816_v34 }
 0x2fc   :  { %1817 = vrcp.f32 %v445_v35 }
 0x306   :  { %v1818_v38 = vpop.eup %1817 }
 0x307   :  { %v448_v39 = vmul.f32 64.0, %v1818_v38 }
 0x309   :  { %v2161_v40 = vsel %vm451_vm2, %v448_v39, 0.0 }
 0x30a   :  { %459 = vrot.lane.b32.xlu1 %v2161_v40, %s1969_s0  ;;  %455 = vrot.lane.b32.xlu0 %v2161_v40, %s1970_s8 }
 0x30e   :  { %461 = vrot.lane.b32.xlu1 %v2161_v40, %s1971_s1  ;;  %457 = vrot.lane.b32.xlu0 %v2161_v40, %s1972_s2 }
 0x312   :  { %465 = vrot.lane.b32.xlu1 %v2161_v40, %s1973_s27  ;;  %463 = vrot.lane.b32.xlu0 %v2161_v40, %s1974_s28 }
 0x316   :  { %470 = vperm.xlu1 %1810, %v2161_v40   ;;  %467 = vrot.lane.b32.xlu0 %v2161_v40, %s1975_s29 }
 0x37c   :  { %v460_v41 = vpop.permute.xlu1 %459  ;;  %v456_v42 = vpop.permute.xlu0 %455 }
 0x37d   :  { %474 = vperm.xlu0 %1811, %v456_v42  }
 0x380   :  { %v462_v43 = vpop.permute.xlu1 %461  ;;  %v458_v44 = vpop.permute.xlu0 %457 }
 0x381   :  { %486 = vperm.xlu0 %1811, %v462_v43   ;;  %478 = vperm.xlu1 %1810, %v458_v44  }
 0x384   :  { %v466_v45 = vpop.permute.xlu1 %465  ;;  %v464_v46 = vpop.permute.xlu0 %463 }
 0x385   :  { %494 = vperm.xlu0 %1811, %v466_v45   ;;  %482 = vperm.xlu1 %1810, %v460_v41  }
 0x388   :  { %v468_v47 = vpop.permute.xlu0 %467 }
 0x389   :  { %490 = vperm.xlu1 %1810, %v464_v46  }
 0x38d   :  { %498 = vperm.xlu1 %1810, %v468_v47  }
 0x38e   :  { %1910 = shalt.err (!%p1907_p12)  }
 0x38f   :  { %s1911_s6 = scalar_lea.vmem %s276_s20, 4096  ;;  %p1916_p0 = scmp.lt.s32.totalorder %s276_s20, %s276_s20 }
 0x390   :  { %p1912_p13 = scmp.ne.s32.totalorder %s276_s20, %s1911_s6  ;;  %p1917_p1 = scmp.lt.s32.totalorder %s1911_s6, %s1911_s6 }
 0x392   :  { %p1918_p2 = por %p1917_p1, %p1916_p0 }
 0x394   :  { %p1919_p3 = pnand %p1918_p2, %p1912_p13 }
 0x396   :  { %1922 = shalt.err (!%p1919_p3)  }
 0x397   :  { %278 = dma.hbm_to_vmem [thread:$0]  %s2287_s9, 4096, %s276_s20, [#allocation9 + $0x6]  ;;  %v453_v48 = vcvt.s32.f32 %v450_v37  ;;  %v471_v49 = vpop.permute.xlu1 %470 }
 0x399   :  { %v501_v50 = vsub.f32 %v453_v48, %v471_v49 }
 0x39b   :  { %v509_v51 = vmul.f32 0.5, %v501_v50 }
 0x39d   :  { %v517_v54 = vmul.f32 -0.5, %v509_v51 }
 0x39f   :  { %v525_v61 = vmul.f32 %v517_v54, %v509_v51 }
 0x3a1   :  { %v533_v9 = vmul.f32 1.442695, %v525_v61 }
 0x3fc   :  { %v475_v52 = vpop.permute.xlu0 %474 }
 0x3fd   :  { %v502_v53 = vsub.f32 %v453_v48, %v475_v52 }
 0x3ff   :  { %v510_v55 = vmul.f32 0.5, %v502_v53  ;;  %v557_v53 = vld [vmem:[#allocation10 + $0x1d] ss:$0 sm:$0xff] }
 0x400   :  { %v479_v56 = vpop.permute.xlu1 %478  ;;  %v487_v57 = vpop.permute.xlu0 %486 }
 0x401   :  { %v518_v58 = vmul.f32 -0.5, %v510_v55  ;;  %v503_v59 = vsub.f32 %v453_v48, %v479_v56  ;;  %v505_v60 = vsub.f32 %v453_v48, %v487_v57 }
 0x403   :  { %v526_v62 = vmul.f32 %v518_v58, %v510_v55  ;;  %v511_v63 = vmul.f32 0.5, %v503_v59  ;;  %v513_v0 = vmul.f32 0.5, %v505_v60 }
 0x404   :  { %v483_v1 = vpop.permute.xlu1 %482  ;;  %v495_v2 = vpop.permute.xlu0 %494 }
 0x405   :  { %v535_v3 = vmul.f32 1.442695, %v526_v62  ;;  %v519_v5 = vmul.f32 -0.5, %v511_v63  ;;  %v521_v7 = vmul.f32 -0.5, %v513_v0  ;;  %v504_v8 = vsub.f32 %v453_v48, %v483_v1 }
 0x406   :  { %v507_v10 = vsub.f32 %v453_v48, %v495_v2 }
 0x407   :  { %v527_v11 = vmul.f32 %v519_v5, %v511_v63  ;;  %v512_v12 = vmul.f32 0.5, %v504_v8  ;;  %v529_v13 = vmul.f32 %v521_v7, %v513_v0  ;;  %1819 = vpow2.f32 %v535_v3 }
 0x408   :  { %v515_v14 = vmul.f32 0.5, %v507_v10  ;;  %v491_v15 = vpop.permute.xlu1 %490  ;;  %1821 = vpow2.f32 %v533_v9 }
 0x409   :  { %v537_v16 = vmul.f32 1.442695, %v527_v11  ;;  %v520_v17 = vmul.f32 -0.5, %v512_v12  ;;  %v506_v18 = vsub.f32 %v453_v48, %v491_v15  ;;  %v541_v22 = vmul.f32 1.442695, %v529_v13 }
 0x40a   :  { %v523_v19 = vmul.f32 -0.5, %v515_v14 }
 0x40b   :  { %1823 = vpow2.f32 %v537_v16  ;;  %v528_v20 = vmul.f32 %v520_v17, %v512_v12  ;;  %v514_v21 = vmul.f32 0.5, %v506_v18 }
 0x40c   :  { %v499_v23 = vpop.permute.xlu1 %498  ;;  %v531_v25 = vmul.f32 %v523_v19, %v515_v14 }
 0x40d   :  { %v539_v24 = vmul.f32 1.442695, %v528_v20  ;;  %v522_v27 = vmul.f32 -0.5, %v514_v21  ;;  %v508_v28 = vsub.f32 %v453_v48, %v499_v23 }
 0x40e   :  { %v545_v31 = vmul.f32 1.442695, %v531_v25 }
 0x40f   :  { %1825 = vpow2.f32 %v539_v24  ;;  %v530_v29 = vmul.f32 %v522_v27, %v514_v21  ;;  %v516_v30 = vmul.f32 0.5, %v508_v28 }
 0x410   :  { %1827 = vpow2.f32 %v541_v22 }
 0x411   :  { %v543_v32 = vmul.f32 1.442695, %v530_v29  ;;  %v524_v33 = vmul.f32 -0.5, %v516_v30  ;;  %v1820_v34 = vpop.eup %1819 }
 0x412   :  { %v1822_v37 = vpop.eup %1821 }
 0x413   :  { %1829 = vpow2.f32 %v543_v32  ;;  %v532_v35 = vmul.f32 %v524_v33, %v516_v30  ;;  %v549_v41 = vadd.f32 %v1822_v37, %v1820_v34 }
 0x414   :  { %1831 = vpow2.f32 %v545_v31 }
 0x415   :  { %v1824_v38 = vpop.eup %1823  ;;  %v547_v39 = vmul.f32 1.442695, %v532_v35 }
 0x416   :  { %v550_v42 = vadd.f32 %v1824_v38, %v549_v41 }
 0x417   :  { %1833 = vpow2.f32 %v547_v39 }
 0x419   :  { %v1826_v43 = vpop.eup %1825 }
 0x41a   :  { %v551_v44 = vadd.f32 %v1826_v43, %v550_v42  ;;  %v1828_v45 = vpop.eup %1827 }
 0x41c   :  { %v552_v46 = vadd.f32 %v1828_v45, %v551_v44 }
 0x41d   :  { %v1830_v47 = vpop.eup %1829 }
 0x41e   :  { %v553_v48 = vadd.f32 %v1830_v47, %v552_v46  ;;  %v1832_v49 = vpop.eup %1831 }
 0x420   :  { %v554_v50 = vadd.f32 %v1832_v49, %v553_v48 }
 0x421   :  { %v1834_v51 = vpop.eup %1833 }
 0x422   :  { %v555_v52 = vadd.f32 %v1834_v51, %v554_v50 }
 0x424   :  { %v556_v54 = vmul.f32 0.19947115, %v555_v52 }
 0x426   :  { %v558_v55 = vmul.f32 %v557_v53, %v556_v54 }
 0x428   :  { %v559_v56 = vpack.c.bf16 %v558_v55, %v558_v55 }
 0x429   :  { %1927 = dma.done.wait [#allocation9], 3072 }
 0x42a   :  { %1928 = vsyncadd [#allocation9], 4294964224  ;;  %1675 = vmatprep.subr.bf16.mxu0 %v1961_v4  ;;  %1691 = vmatprep.mubr.msk.bf16.mxu0 %vm1962_vm0, %v1961_v4  ;;  %v565_v57 = vld [vmem:[#allocation2 + $0x8] sm:$0xff]  ;;  %v566_v58 = vld [vmem:[#allocation2 + $0x10] sm:$0xff]  ;;  %v2195_v19 = vshrl.u32 %v449_v36, 7 }
 0x42b   :  { %638 = vmatprep.mubr.bf16.mxu1 %v1968_v26  ;;  %v564_v59 = vld [vmem:[#allocation2] sm:$0xff]  ;;  %606 = vmatprep.subr.bf16.mxu1 %v565_v57  ;;  %v569_v61 = vld [vmem:[#allocation2 + $0x28] sm:$0xff]  ;;  %v567_v62 = vld [vmem:[#allocation2 + $0x18] sm:$0xff] }
 0x42c   :  { %1676 = vmatpush3.bf16.msra.mxu0 %v566_v58  ;;  %v568_v60 = vld [vmem:[#allocation2 + $0x20] sm:$0xff]  ;;  %607 = vmatpush1.bf16.msra.mxu1 %v564_v59  ;;  %v571_v63 = vld [vmem:[#allocation2 + $0x38] sm:$0xff]  ;;  %v570_v1 = vld [vmem:[#allocation2 + $0x30] sm:$0xff]  ;;  %v601_v20 = vsub.s32 2, %v2195_v19  ;;  %v2199_v22 = vsub.s32 0, %v2195_v19  ;;  %v2202_v23 = vsub.s32 1, %v2195_v19 }
 0x42d   :  { %1677 = vmatprep.subr.bf16.mxu0 %v1961_v4  ;;  %608 = vmatprep.subr.bf16.mxu1 %v568_v60  ;;  %v572_v0 = vld [vmem:[#allocation2 + $0x40] sm:$0xff]  ;;  %v574_v2 = vld [vmem:[#allocation2 + $0x50] sm:$0xff]  ;;  %v575_v3 = vld [vmem:[#allocation2 + $0x58] sm:$0xff] }
 0x42e   :  { %v573_v5 = vld [vmem:[#allocation2 + $0x48] sm:$0xff]  ;;  %v578_v8 = vld [vmem:[#allocation2 + $0x70] sm:$0xff]  ;;  %v576_v9 = vld [vmem:[#allocation2 + $0x60] sm:$0xff] }
 0x42f   :  { %v577_v7 = vld [vmem:[#allocation2 + $0x68] sm:$0xff]  ;;  %v580_v10 = vld [vmem:[#allocation2 + $0x80] sm:$0xff]  ;;  %v579_v12 = vld [vmem:[#allocation2 + $0x78] sm:$0xff] }
 0x430   :  { %1678 = vmatpush3.bf16.msra.mxu0 %v569_v61  ;;  %609 = vmatpush1.bf16.msra.mxu1 %v567_v62  ;;  %v581_v11 = vld [vmem:[#allocation2 + $0x88] sm:$0xff]  ;;  %v583_v13 = vld [vmem:[#allocation2 + $0x98] sm:$0xff]  ;;  %v584_v14 = vld [vmem:[#allocation2 + $0xa0] sm:$0xff] }
 0x431   :  { %1679 = vmatprep.subr.bf16.mxu0 %v1961_v4  ;;  %610 = vmatprep.subr.bf16.mxu1 %v571_v63  ;;  %v582_v15 = vld [vmem:[#allocation2 + $0x90] sm:$0xff]  ;;  %v587_v17 = vld [vmem:[#allocation2 + $0xb8] sm:$0xff]  ;;  %v585_v18 = vld [vmem:[#allocation2 + $0xa8] sm:$0xff] }
 0x432   :  { %v586_v16 = vld [vmem:[#allocation2 + $0xb0] sm:$0xff] }
 0x433   :  { %v589_v21 = vld [vmem:[#allocation10 + $0x3] ss:$8 sm:$0x7] }
 0x434   :  { %1680 = vmatpush3.bf16.msra.mxu0 %v572_v0  ;;  %611 = vmatpush1.bf16.msra.mxu1 %v570_v1  ;;  %v602_v24 = vrot.slane %v589_v21, %v601_v20  ;;  %v594_v25 = vrot.slane %v589_v21, %v2199_v22  ;;  %v598_v27 = vrot.slane %v589_v21, %v2202_v23 }
 0x435   :  { %1681 = vmatprep.subr.bf16.mxu0 %v1961_v4  ;;  %612 = vmatprep.subr.bf16.mxu1 %v574_v2 }
 0x438   :  { %1682 = vmatpush3.bf16.msra.mxu0 %v575_v3  ;;  %613 = vmatpush1.bf16.msra.mxu1 %v573_v5 }
 0x439   :  { %1683 = vmatprep.subr.bf16.mxu0 %v1961_v4  ;;  %614 = vmatprep.subr.bf16.mxu1 %v577_v7 }
 0x43c   :  { %1684 = vmatpush3.bf16.msra.mxu0 %v578_v8  ;;  %615 = vmatpush1.bf16.msra.mxu1 %v576_v9 }
 0x43d   :  { %1685 = vmatprep.subr.bf16.mxu0 %v1961_v4  ;;  %616 = vmatprep.subr.bf16.mxu1 %v580_v10 }
 0x440   :  { %1686 = vmatpush3.bf16.msra.mxu0 %v581_v11  ;;  %617 = vmatpush1.bf16.msra.mxu1 %v579_v12 }
 0x441   :  { %1687 = vmatprep.subr.bf16.mxu0 %v1961_v4  ;;  %618 = vmatprep.subr.bf16.mxu1 %v583_v13 }
 0x444   :  { %1688 = vmatpush3.bf16.msra.mxu0 %v584_v14  ;;  %619 = vmatpush1.bf16.msra.mxu1 %v582_v15 }
 0x445   :  { %1689 = vmatprep.subr.bf16.mxu0 %v1961_v4  ;;  %620 = vmatprep.subr.bf16.mxu1 %v586_v16 }
 0x448   :  { %1690 = vmatpush3.bf16.msra.mxu0 %v587_v17  ;;  %621 = vmatpush1.bf16.msra.mxu1 %v585_v18 }
 0x44b   :  { %1692 = vmatmul.mubr.bf16.vlgmr.msra.gmra.mrb[4].mxu0 %v559_v56  ;;  %639 = vmatmul.mubr.bf16.vlgmr.msra.gmra.mrb[8].mxu1 %v559_v56 }
 0x51e   :  { %v681_v28 = vpop.f32.mrb[4].mxu0  ;;  %v640_v36 = vpop.f32.mrb[8].mxu1 }
 0x51f   :  { %v682_v29 = vadd.f32 %v681_v28, %v602_v24  ;;  %v1693_v30 = vpop.f32.mrb[5].mxu0  ;;  %v641_v31 = vadd.f32 %v640_v36, %v594_v25  ;;  %v642_v32 = vpop.f32.mrb[9].mxu1 }
 0x520   :  { %v684_v33 = vpop.f32.mrb[6].mxu0  ;;  %v643_v35 = vadd.f32 %v642_v32, %v598_v27  ;;  %v644_v37 = vpop.f32.mrb[10].mxu1 }
 0x521   :  { %v689_v34 = vmax.f32 %v682_v29, 0.0  ;;  %v1694_v38 = vpop.f32.mrb[7].mxu0  ;;  %v687_v39 = vmax.f32 %v641_v31, 0.0  ;;  %v645_v41 = vpop.f32.mrb[11].mxu1 }
 0x522   :  { %v688_v43 = vmax.f32 %v643_v35, 0.0 }
 0x523   :  { %v2208_v42 = vpack.c.bf16 %v689_v34, %v689_v34  ;;  %v2210_v44 = vpack.c.bf16 %v687_v39, %v687_v39 }
 0x524   :  { %v691_v45 = vpack.c.bf16 %v688_v43, %v688_v43 }
 0x525   :  { %1929 = dma.done.wait [#allocation9 + $0x1], 6144 }
 0x526   :  { %1930 = vsyncadd [#allocation9 + $0x1], 4294961152  ;;  %790 = vmatprep.mubr.bf16.mxu1 %v691_v45  ;;  %v698_v46 = vld [vmem:[#allocation3 + $0x8] sm:$0xff]  ;;  %v697_v47 = vld [vmem:[#allocation3] sm:$0xff] }
 0x527   :  { %v700_v48 = vld [vmem:[#allocation3 + $0x18] sm:$0xff]  ;;  %758 = vmatprep.subr.bf16.mxu1 %v698_v46  ;;  %v699_v49 = vld [vmem:[#allocation3 + $0x10] sm:$0xff]  ;;  %v702_v50 = vld [vmem:[#allocation3 + $0x28] sm:$0xff] }
 0x528   :  { %759 = vmatpush1.bf16.msra.mxu1 %v697_v47  ;;  %v701_v51 = vld [vmem:[#allocation3 + $0x20] sm:$0xff]  ;;  %v704_v52 = vld [vmem:[#allocation3 + $0x38] sm:$0xff]  ;;  %v703_v53 = vld [vmem:[#allocation3 + $0x30] sm:$0xff] }
 0x529   :  { %760 = vmatprep.subr.bf16.mxu1 %v700_v48  ;;  %v706_v54 = vld [vmem:[#allocation3 + $0x48] sm:$0xff]  ;;  %v705_v55 = vld [vmem:[#allocation3 + $0x40] sm:$0xff]  ;;  %v708_v56 = vld [vmem:[#allocation3 + $0x58] sm:$0xff] }
 0x52a   :  { %v707_v57 = vld [vmem:[#allocation3 + $0x50] sm:$0xff]  ;;  %v710_v58 = vld [vmem:[#allocation3 + $0x68] sm:$0xff]  ;;  %v709_v59 = vld [vmem:[#allocation3 + $0x60] sm:$0xff] }
 0x52b   :  { %v712_v60 = vld [vmem:[#allocation3 + $0x78] sm:$0xff]  ;;  %v711_v61 = vld [vmem:[#allocation3 + $0x70] sm:$0xff]  ;;  %v714_v62 = vld [vmem:[#allocation3 + $0x88] sm:$0xff] }
 0x52c   :  { %761 = vmatpush1.bf16.msra.mxu1 %v699_v49  ;;  %v713_v63 = vld [vmem:[#allocation3 + $0x80] sm:$0xff]  ;;  %v716_v0 = vld [vmem:[#allocation3 + $0x98] sm:$0xff]  ;;  %v715_v1 = vld [vmem:[#allocation3 + $0x90] sm:$0xff] }
 0x52d   :  { %762 = vmatprep.subr.bf16.mxu1 %v702_v50  ;;  %v718_v2 = vld [vmem:[#allocation3 + $0xa8] sm:$0xff]  ;;  %v717_v3 = vld [vmem:[#allocation3 + $0xa0] sm:$0xff]  ;;  %v720_v5 = vld [vmem:[#allocation3 + $0xb8] sm:$0xff] }
 0x52e   :  { %v719_v7 = vld [vmem:[#allocation3 + $0xb0] sm:$0xff]  ;;  %v722_v8 = vld [vmem:[#allocation3 + $0xc8] sm:$0xff]  ;;  %v721_v9 = vld [vmem:[#allocation3 + $0xc0] sm:$0xff] }
 0x52f   :  { %v724_v10 = vld [vmem:[#allocation3 + $0xd8] sm:$0xff]  ;;  %v723_v11 = vld [vmem:[#allocation3 + $0xd0] sm:$0xff]  ;;  %v726_v12 = vld [vmem:[#allocation3 + $0xe8] sm:$0xff] }
 0x530   :  { %763 = vmatpush1.bf16.msra.mxu1 %v701_v51  ;;  %v725_v13 = vld [vmem:[#allocation3 + $0xe0] sm:$0xff]  ;;  %v728_v14 = vld [vmem:[#allocation3 + $0xf8] sm:$0xff]  ;;  %v727_v15 = vld [vmem:[#allocation3 + $0xf0] sm:$0xff] }
 0x531   :  { %764 = vmatprep.subr.bf16.mxu1 %v704_v52  ;;  %v730_v16 = vld [vmem:[#allocation3 + $0x108] sm:$0xff]  ;;  %v729_v17 = vld [vmem:[#allocation3 + $0x100] sm:$0xff]  ;;  %v732_v18 = vld [vmem:[#allocation3 + $0x118] sm:$0xff] }
 0x532   :  { %v731_v21 = vld [vmem:[#allocation3 + $0x110] sm:$0xff]  ;;  %v734_v24 = vld [vmem:[#allocation3 + $0x128] sm:$0xff]  ;;  %v733_v25 = vld [vmem:[#allocation3 + $0x120] sm:$0xff] }
 0x533   :  { %v736_v27 = vld [vmem:[#allocation3 + $0x138] sm:$0xff]  ;;  %v735_v28 = vld [vmem:[#allocation3 + $0x130] sm:$0xff]  ;;  %v738_v29 = vld [vmem:[#allocation3 + $0x148] sm:$0xff] }
 0x534   :  { %765 = vmatpush1.bf16.msra.mxu1 %v703_v53  ;;  %v737_v36 = vld [vmem:[#allocation3 + $0x140] sm:$0xff]  ;;  %v740_v30 = vld [vmem:[#allocation3 + $0x158] sm:$0xff]  ;;  %v739_v31 = vld [vmem:[#allocation3 + $0x150] sm:$0xff] }
 0x535   :  { %766 = vmatprep.subr.bf16.mxu1 %v706_v54  ;;  %v742_v32 = vld [vmem:[#allocation3 + $0x168] sm:$0xff]  ;;  %v741_v33 = vld [vmem:[#allocation3 + $0x160] sm:$0xff]  ;;  %v744_v34 = vld [vmem:[#allocation3 + $0x178] sm:$0xff] }
 0x536   :  { %v743_v35 = vld [vmem:[#allocation3 + $0x170] sm:$0xff] }
 0x537   :  { %v746_v37 = vld [vmem:[#allocation10 + $0x4] ss:$8 sm:$0x3] }
 0x538   :  { %767 = vmatpush1.bf16.msra.mxu1 %v705_v55  ;;  %v751_v38 = vrot.slane %v746_v37, %v2199_v22  ;;  %v755_v39 = vrot.slane %v746_v37, %v2202_v23 }
 0x539   :  { %768 = vmatprep.subr.bf16.mxu1 %v708_v56 }
 0x53c   :  { %769 = vmatpush1.bf16.msra.mxu1 %v707_v57 }
 0x53d   :  { %770 = vmatprep.subr.bf16.mxu1 %v710_v58 }
 0x540   :  { %771 = vmatpush1.bf16.msra.mxu1 %v709_v59 }
 0x541   :  { %772 = vmatprep.subr.bf16.mxu1 %v712_v60 }
 0x544   :  { %773 = vmatpush1.bf16.msra.mxu1 %v711_v61 }
 0x545   :  { %774 = vmatprep.subr.bf16.mxu1 %v714_v62 }
 0x548   :  { %775 = vmatpush1.bf16.msra.mxu1 %v713_v63 }
 0x549   :  { %776 = vmatprep.subr.bf16.mxu1 %v716_v0 }
 0x54c   :  { %777 = vmatpush1.bf16.msra.mxu1 %v715_v1 }
 0x54d   :  { %778 = vmatprep.subr.bf16.mxu1 %v718_v2 }
 0x550   :  { %779 = vmatpush1.bf16.msra.mxu1 %v717_v3 }
 0x551   :  { %780 = vmatprep.subr.bf16.mxu1 %v720_v5 }
 0x554   :  { %781 = vmatpush1.bf16.msra.mxu1 %v719_v7 }
 0x555   :  { %782 = vmatprep.subr.bf16.mxu1 %v722_v8 }
 0x558   :  { %783 = vmatpush1.bf16.msra.mxu1 %v721_v9 }
 0x559   :  { %784 = vmatprep.subr.bf16.mxu1 %v724_v10 }
 0x55c   :  { %785 = vmatpush1.bf16.msra.mxu1 %v723_v11 }
 0x55d   :  { %786 = vmatprep.subr.bf16.mxu1 %v726_v12 }
 0x560   :  { %787 = vmatpush1.bf16.msra.mxu1 %v725_v13 }
 0x561   :  { %788 = vmatprep.subr.bf16.mxu1 %v728_v14 }
 0x564   :  { %789 = vmatpush1.bf16.msra.mxu1 %v727_v15 }
 0x565   :  { %799 = vmatprep.subr.bf16.mxu1 %v730_v16 }
 0x567   :  { %791 = vmatmul.mubr.bf16.vlgmr.msra.gmra.mrb[12].mxu1 %v2210_v44 }
 0x568   :  { %800 = vmatpush1.bf16.msra.mxu1 %v729_v17  ;;  %831 = vmatprep.mubr.bf16.mxu1 %v1968_v26 }
 0x569   :  { %801 = vmatprep.subr.bf16.mxu1 %v732_v18 }
 0x56c   :  { %802 = vmatpush1.bf16.msra.mxu1 %v731_v21 }
 0x56d   :  { %803 = vmatprep.subr.bf16.mxu1 %v734_v24 }
 0x570   :  { %804 = vmatpush1.bf16.msra.mxu1 %v733_v25 }
 0x571   :  { %805 = vmatprep.subr.bf16.mxu1 %v736_v27 }
 0x574   :  { %806 = vmatpush1.bf16.msra.mxu1 %v735_v28 }
 0x575   :  { %807 = vmatprep.subr.bf16.mxu1 %v738_v29 }
 0x578   :  { %808 = vmatpush1.bf16.msra.mxu1 %v737_v36 }
 0x579   :  { %809 = vmatprep.subr.bf16.mxu1 %v740_v30 }
 0x57c   :  { %810 = vmatpush1.bf16.msra.mxu1 %v739_v31 }
 0x57d   :  { %811 = vmatprep.subr.bf16.mxu1 %v742_v32 }
 0x580   :  { %812 = vmatpush1.bf16.msra.mxu1 %v741_v33 }
 0x581   :  { %813 = vmatprep.subr.bf16.mxu1 %v744_v34 }
 0x584   :  { %814 = vmatpush1.bf16.msra.mxu1 %v743_v35 }
 0x587   :  { %832 = vmatmul.mubr.bf16.vlgmr.msra.gmra.mrb[12].mxu1 %v2208_v42 }
 0x65a   :  { %v833_v41 = vpop.f32.mrb[12].mxu1 }
 0x65b   :  { %v1767_v43 = vadd.f32 %v833_v41, %v751_v38  ;;  %v835_v44 = vpop.f32.mrb[13].mxu1 }
 0x65c   :  { %v1768_v45 = vadd.f32 %v835_v44, %v755_v39  ;;  %v837_v46 = vpop.f32.mrb[14].mxu1 }
 0x65d   :  { %v840_v47 = vmax.f32 %v1767_v43, 0.0  ;;  %v838_v48 = vpop.f32.mrb[15].mxu1 }
 0x65e   :  { %v841_v49 = vmax.f32 %v1768_v45, 0.0 }
 0x65f   :  { %v842_v50 = vpack.c.bf16 %v840_v47, %v840_v47 }
 0x660   :  { %v843_v51 = vpack.c.bf16 %v841_v49, %v841_v49 }
 0x661   :  { %1931 = dma.done.wait [#allocation9 + $0x2], 3072 }
 0x662   :  { %1932 = vsyncadd [#allocation9 + $0x2], 4294964224  ;;  %896 = vmatprep.mubr.bf16.mxu0 %v843_v51  ;;  %v855_v52 = vld [vmem:[#allocation4 + $0x40] sm:$0xff]  ;;  %v856_v53 = vld [vmem:[#allocation4 + $0x48] sm:$0xff] }
 0x663   :  { %v847_v42 = vld [vmem:[#allocation4] sm:$0xff]  ;;  %1560 = vmatprep.subr.bf16.mxu0 %v855_v52  ;;  %v848_v54 = vld [vmem:[#allocation4 + $0x8] sm:$0xff]  ;;  %v857_v55 = vld [vmem:[#allocation4 + $0x50] sm:$0xff] }
 0x664   :  { %1561 = vmatpush3.bf16.msra.mxu0 %v847_v42  ;;  %v849_v56 = vld [vmem:[#allocation4 + $0x10] sm:$0xff]  ;;  %v858_v57 = vld [vmem:[#allocation4 + $0x58] sm:$0xff]  ;;  %v859_v59 = vld [vmem:[#allocation4 + $0x60] sm:$0xff] }
 0x665   :  { %1562 = vmatprep.subr.bf16.mxu0 %v856_v53  ;;  %v850_v58 = vld [vmem:[#allocation4 + $0x18] sm:$0xff]  ;;  %v851_v60 = vld [vmem:[#allocation4 + $0x20] sm:$0xff]  ;;  %v860_v61 = vld [vmem:[#allocation4 + $0x68] sm:$0xff] }
 0x666   :  { %v852_v62 = vld [vmem:[#allocation4 + $0x28] sm:$0xff]  ;;  %v861_v63 = vld [vmem:[#allocation4 + $0x70] sm:$0xff]  ;;  %v862_v1 = vld [vmem:[#allocation4 + $0x78] sm:$0xff] }
 0x667   :  { %v853_v0 = vld [vmem:[#allocation4 + $0x30] sm:$0xff]  ;;  %v854_v2 = vld [vmem:[#allocation4 + $0x38] sm:$0xff]  ;;  %v906_v3 = vld [vmem:[#allocation4 + $0x80] sm:$0xff] }
 0x668   :  { %1563 = vmatpush3.bf16.msra.mxu0 %v848_v54  ;;  %v907_v5 = vld [vmem:[#allocation4 + $0x88] sm:$0xff]  ;;  %v908_v7 = vld [vmem:[#allocation4 + $0x90] sm:$0xff]  ;;  %v909_v8 = vld [vmem:[#allocation4 + $0x98] sm:$0xff] }
 0x669   :  { %1564 = vmatprep.subr.bf16.mxu0 %v857_v55  ;;  %v910_v9 = vld [vmem:[#allocation4 + $0xa0] sm:$0xff]  ;;  %v911_v10 = vld [vmem:[#allocation4 + $0xa8] sm:$0xff]  ;;  %v912_v11 = vld [vmem:[#allocation4 + $0xb0] sm:$0xff] }
 0x66a   :  { %v913_v12 = vld [vmem:[#allocation4 + $0xb8] sm:$0xff]  ;;  %v863_v14 = vld [vmem:[#allocation10 + $0x5] ss:$0 sm:$0xff]  ;;  %v914_v27 = vld [vmem:[#allocation10 + $0x6] ss:$0 sm:$0xff] }
 0x66c   :  { %1565 = vmatpush3.bf16.msra.mxu0 %v849_v56 }
 0x66d   :  { %1566 = vmatprep.subr.bf16.mxu0 %v858_v57 }
 0x670   :  { %1567 = vmatpush3.bf16.msra.mxu0 %v850_v58 }
 0x671   :  { %1568 = vmatprep.subr.bf16.mxu0 %v859_v59 }
 0x674   :  { %1569 = vmatpush3.bf16.msra.mxu0 %v851_v60 }
 0x675   :  { %1570 = vmatprep.subr.bf16.mxu0 %v860_v61 }
 0x678   :  { %1571 = vmatpush3.bf16.msra.mxu0 %v852_v62 }
 0x679   :  { %1572 = vmatprep.subr.bf16.mxu0 %v861_v63 }
 0x67c   :  { %1573 = vmatpush3.bf16.msra.mxu0 %v853_v0 }
 0x67d   :  { %1574 = vmatprep.subr.bf16.mxu0 %v862_v1 }
 0x680   :  { %1575 = vmatpush3.bf16.msra.mxu0 %v854_v2 }
 0x681   :  { %1695 = vmatprep.subr.bf16.mxu0 %v1961_v4 }
 0x683   :  { %897 = vmatmul.mubr.bf16.vlgmr.msra.gmra.mrb[8].mxu0 %v842_v50 }
 0x684   :  { %1696 = vmatpush3.bf16.msra.mxu0 %v906_v3  ;;  %1711 = vmatprep.mubr.msk.bf16.mxu0 %vm1962_vm0, %v1961_v4 }
 0x685   :  { %1697 = vmatprep.subr.bf16.mxu0 %v1961_v4 }
 0x688   :  { %1698 = vmatpush3.bf16.msra.mxu0 %v907_v5 }
 0x689   :  { %1699 = vmatprep.subr.bf16.mxu0 %v1961_v4 }
 0x68c   :  { %1700 = vmatpush3.bf16.msra.mxu0 %v908_v7 }
 0x68d   :  { %1701 = vmatprep.subr.bf16.mxu0 %v1961_v4 }
 0x690   :  { %1702 = vmatpush3.bf16.msra.mxu0 %v909_v8 }
 0x691   :  { %1703 = vmatprep.subr.bf16.mxu0 %v1961_v4 }
 0x694   :  { %1704 = vmatpush3.bf16.msra.mxu0 %v910_v9 }
 0x695   :  { %1705 = vmatprep.subr.bf16.mxu0 %v1961_v4 }
 0x698   :  { %1706 = vmatpush3.bf16.msra.mxu0 %v911_v10 }
 0x699   :  { %1707 = vmatprep.subr.bf16.mxu0 %v1961_v4 }
 0x69c   :  { %1708 = vmatpush3.bf16.msra.mxu0 %v912_v11 }
 0x69d   :  { %1709 = vmatprep.subr.bf16.mxu0 %v1961_v4 }
 0x6a0   :  { %1710 = vmatpush3.bf16.msra.mxu0 %v913_v12 }
 0x756   :  { %v1576_v13 = vpop.f32.mrb[8].mxu0 }
 0x757   :  { %v1577_v15 = vpop.f32.mrb[9].mxu0 }
 0x758   :  { %v1578_v16 = vadd.f32 %v1577_v15, %v1576_v13  ;;  %v1579_v17 = vpop.f32.mrb[10].mxu0 }
 0x759   :  { %v1580_v18 = vpop.f32.mrb[11].mxu0 }
 0x75a   :  { %v899_v21 = vadd.f32 %v1578_v16, %v863_v14 }
 0x75c   :  { %v904_v24 = vmax.f32 %v899_v21, 0.0 }
 0x75e   :  { %v905_v25 = vpack.c.bf16 %v904_v24, %v904_v24 }
 0x760   :  { %1712 = vmatmul.mubr.bf16.vlgmr.msra.gmra.mrb[12].mxu0 %v905_v25 }
 0x833   :  { %v949_v28 = vpop.f32.mrb[12].mxu0 }
 0x834   :  { %v950_v29 = vadd.f32 %v949_v28, %v914_v27  ;;  %v1713_v36 = vpop.f32.mrb[13].mxu0 }
 0x835   :  { %v952_v30 = vpop.f32.mrb[14].mxu0 }
 0x836   :  { %v955_v31 = vpack.c.bf16 %v950_v29, %v950_v29  ;;  %v1714_v32 = vpop.f32.mrb[15].mxu0 }
 0x837   :  { %1933 = dma.done.wait [#allocation9 + $0x3], 256 }
 0x838   :  { %1934 = vsyncadd [#allocation9 + $0x3], 4294967040  ;;  %1715 = vmatprep.subr.bf16.mxu0 %v1961_v4  ;;  %1717 = vmatprep.mubr.msk.bf16.mxu0 %vm1962_vm0, %v1961_v4  ;;  %s1977_s9 = smov 8   ;;  %v960_v33 = vld [vmem:[#allocation5] sm:$0xff]  ;;  %v1009_v34 = vld [vmem:[#allocation5 + $0x8] sm:$0xff] }
 0x839   :  { %1005 = vrot.lane.b32.xlu0 %v2148_v6, %s1977_s9  ;;  %1716 = vmatpush3.bf16.msra.mxu0 %v960_v33  ;;  %v961_v35 = vld [vmem:[#allocation10 + $0x7] ss:$0 sm:$0xff]  ;;  %v1010_v46 = vld [vmem:[#allocation10 + $0x18] ss:$0 sm:$0xff] }
 0x83a   :  { %1721 = vmatprep.subr.bf16.mxu0 %v1961_v4 }
 0x83c   :  { %1718 = vmatmul.mubr.msk.bf16.vlgmr.msra.gmra.mrb[16].mxu0 %vm290_vm1, %v955_v31 }
 0x83d   :  { %1722 = vmatpush3.bf16.msra.mxu0 %v1009_v34  ;;  %1723 = vmatprep.mubr.msk.bf16.mxu0 %vm1962_vm0, %v1961_v4 }
 0x8ab   :  { %v1006_v38 = vpop.permute.xlu0 %1005 }
 0x90f   :  { %v999_v37 = vpop.f32.mrb[16].mxu0 }
 0x910   :  { %v1000_v39 = vadd.f32 %v999_v37, %v961_v35  ;;  %v1719_v41 = vpop.f32.mrb[17].mxu0 }
 0x911   :  { %v1002_v43 = vpop.f32.mrb[18].mxu0 }
 0x912   :  { %v1007_v44 = vadd.f32 %v1006_v38, %v1000_v39  ;;  %v1720_v45 = vpop.f32.mrb[19].mxu0 }
 0x914   :  { %v1008_v6 = vpack.c.bf16 %v1007_v44, %v1007_v44 }
 0x916   :  { %1724 = vmatmul.mubr.msk.bf16.vlgmr.msra.gmra.mrb[20].mxu0 %vm290_vm1, %v1008_v6 }
 0x9e9   :  { %v1048_v47 = vpop.f32.mrb[20].mxu0 }
 0x9ea   :  { %v1049_v48 = vadd.f32 %v1048_v47, %v1010_v46  ;;  %v1725_v49 = vpop.f32.mrb[21].mxu0 }
 0x9eb   :  { %v1051_v50 = vpop.f32.mrb[22].mxu0 }
 0x9ec   :  { %v1054_v51 = vmax.f32 %v1049_v48, 0.0  ;;  %v1726_v52 = vpop.f32.mrb[23].mxu0 }
 0x9ee   :  { %v1055_v42 = vpack.c.bf16 %v1054_v51, %v1054_v51 }
 0x9ef   :  { %1935 = dma.done.wait [#allocation9 + $0x4], 2048 }
 0x9f0   :  { %1936 = vsyncadd [#allocation9 + $0x4], 4294965248  ;;  %1120 = vmatprep.mubr.bf16.mxu0 %v1968_v26  ;;  %v1060_v53 = vld [vmem:[#allocation6 + $0x8] sm:$0xff]  ;;  %v1059_v54 = vld [vmem:[#allocation6] sm:$0xff] }
 0x9f1   :  { %v1062_v55 = vld [vmem:[#allocation6 + $0x18] sm:$0xff]  ;;  %1088 = vmatprep.subr.bf16.mxu0 %v1060_v53  ;;  %v1061_v56 = vld [vmem:[#allocation6 + $0x10] sm:$0xff]  ;;  %v1064_v57 = vld [vmem:[#allocation6 + $0x28] sm:$0xff] }
 0x9f2   :  { %1089 = vmatpush1.bf16.msra.mxu0 %v1059_v54  ;;  %v1063_v58 = vld [vmem:[#allocation6 + $0x20] sm:$0xff]  ;;  %v1066_v59 = vld [vmem:[#allocation6 + $0x38] sm:$0xff]  ;;  %v1065_v60 = vld [vmem:[#allocation6 + $0x30] sm:$0xff] }
 0x9f3   :  { %1090 = vmatprep.subr.bf16.mxu0 %v1062_v55  ;;  %v1068_v61 = vld [vmem:[#allocation6 + $0x48] sm:$0xff]  ;;  %v1067_v62 = vld [vmem:[#allocation6 + $0x40] sm:$0xff]  ;;  %v1070_v26 = vld [vmem:[#allocation6 + $0x58] sm:$0xff] }
 0x9f4   :  { %v1069_v63 = vld [vmem:[#allocation6 + $0x50] sm:$0xff]  ;;  %v1072_v0 = vld [vmem:[#allocation6 + $0x68] sm:$0xff]  ;;  %v1071_v1 = vld [vmem:[#allocation6 + $0x60] sm:$0xff] }
 0x9f5   :  { %v1074_v2 = vld [vmem:[#allocation6 + $0x78] sm:$0xff]  ;;  %v1073_v3 = vld [vmem:[#allocation6 + $0x70] sm:$0xff] }
 0x9f6   :  { %1091 = vmatpush1.bf16.msra.mxu0 %v1061_v56  ;;  %v1076_v5 = vld [vmem:[#allocation10 + $0x19] ss:$8 sm:$0x3] }
 0x9f7   :  { %1092 = vmatprep.subr.bf16.mxu0 %v1064_v57  ;;  %v1081_v7 = vrot.slane %v1076_v5, %v2199_v22  ;;  %v1085_v8 = vrot.slane %v1076_v5, %v2202_v23 }
 0x9fa   :  { %1093 = vmatpush1.bf16.msra.mxu0 %v1063_v58 }
 0x9fb   :  { %1094 = vmatprep.subr.bf16.mxu0 %v1066_v59 }
 0x9fe   :  { %1095 = vmatpush1.bf16.msra.mxu0 %v1065_v60 }
 0x9ff   :  { %1096 = vmatprep.subr.bf16.mxu0 %v1068_v61 }
 0xa02   :  { %1097 = vmatpush1.bf16.msra.mxu0 %v1067_v62 }
 0xa03   :  { %1098 = vmatprep.subr.bf16.mxu0 %v1070_v26 }
 0xa06   :  { %1099 = vmatpush1.bf16.msra.mxu0 %v1069_v63 }
 0xa07   :  { %1100 = vmatprep.subr.bf16.mxu0 %v1072_v0 }
 0xa0a   :  { %1101 = vmatpush1.bf16.msra.mxu0 %v1071_v1 }
 0xa0b   :  { %1102 = vmatprep.subr.bf16.mxu0 %v1074_v2 }
 0xa0e   :  { %1103 = vmatpush1.bf16.msra.mxu0 %v1073_v3 }
 0xa11   :  { %1121 = vmatmul.mubr.bf16.vlgmr.msra.gmra.mrb[24].mxu0 %v1055_v42 }
 0xae4   :  { %v1122_v9 = vpop.f32.mrb[24].mxu0 }
 0xae5   :  { %v1123_v10 = vadd.f32 %v1122_v9, %v1081_v7  ;;  %v1124_v11 = vpop.f32.mrb[25].mxu0 }
 0xae6   :  { %v1125_v12 = vadd.f32 %v1124_v11, %v1085_v8  ;;  %v1126_v13 = vpop.f32.mrb[26].mxu0 }
 0xae7   :  { %v1129_v14 = vmax.f32 %v1123_v10, 0.0  ;;  %v1127_v15 = vpop.f32.mrb[27].mxu0 }
 0xae8   :  { %v1130_v16 = vmax.f32 %v1125_v12, 0.0 }
 0xae9   :  { %v2239_v17 = vpack.c.bf16 %v1129_v14, %v1129_v14 }
 0xaea   :  { %v1132_v18 = vpack.c.bf16 %v1130_v16, %v1130_v16 }
 0xaeb   :  { %1937 = dma.done.wait [#allocation9 + $0x5], 6144 }
 0xaec   :  { %1938 = vsyncadd [#allocation9 + $0x5], 4294961152  ;;  %1276 = vmatprep.mubr.bf16.mxu0 %v1132_v18  ;;  %1235 = vmatprep.mubr.bf16.mxu1 %v1132_v18  ;;  %v1138_v21 = vld [vmem:[#allocation7 + $0x8] sm:$0xff]  ;;  %v1137_v24 = vld [vmem:[#allocation7] sm:$0xff] }
 0xaed   :  { %v1141_v25 = vld [vmem:[#allocation7 + $0x20] sm:$0xff]  ;;  %1203 = vmatprep.subr.bf16.mxu1 %v1138_v21  ;;  %v1140_v27 = vld [vmem:[#allocation7 + $0x18] sm:$0xff]  ;;  %v1163_v29 = vld [vmem:[#allocation7 + $0xd0] sm:$0xff] }
 0xaee   :  { %1204 = vmatpush1.bf16.msra.mxu1 %v1137_v24  ;;  %v1144_v28 = vld [vmem:[#allocation7 + $0x38] sm:$0xff]  ;;  %1595 = vmatprep.subr.bf16.mxu0 %v1163_v29  ;;  %v1139_v36 = vld [vmem:[#allocation7 + $0x10] sm:$0xff]  ;;  %v1166_v30 = vld [vmem:[#allocation7 + $0xe8] sm:$0xff] }
 0xaef   :  { %1205 = vmatprep.subr.bf16.mxu1 %v1141_v25  ;;  %1596 = vmatpush3.bf16.msra.mxu0 %v1139_v36  ;;  %v1143_v31 = vld [vmem:[#allocation7 + $0x30] sm:$0xff]  ;;  %v1142_v32 = vld [vmem:[#allocation7 + $0x28] sm:$0xff]  ;;  %v1169_v34 = vld [vmem:[#allocation7 + $0x100] sm:$0xff] }
 0xaf0   :  { %1597 = vmatprep.subr.bf16.mxu0 %v1166_v30  ;;  %v1147_v33 = vld [vmem:[#allocation7 + $0x50] sm:$0xff]  ;;  %v1146_v35 = vld [vmem:[#allocation7 + $0x48] sm:$0xff]  ;;  %v1145_v37 = vld [vmem:[#allocation7 + $0x40] sm:$0xff] }
 0xaf1   :  { %v1150_v38 = vld [vmem:[#allocation7 + $0x68] sm:$0xff]  ;;  %v1172_v39 = vld [vmem:[#allocation7 + $0x118] sm:$0xff]  ;;  %v1149_v41 = vld [vmem:[#allocation7 + $0x60] sm:$0xff] }
 0xaf2   :  { %1206 = vmatpush1.bf16.msra.mxu1 %v1140_v27  ;;  %v1148_v43 = vld [vmem:[#allocation7 + $0x58] sm:$0xff]  ;;  %v1153_v44 = vld [vmem:[#allocation7 + $0x80] sm:$0xff]  ;;  %v1175_v45 = vld [vmem:[#allocation7 + $0x130] sm:$0xff] }
 0xaf3   :  { %1207 = vmatprep.subr.bf16.mxu1 %v1144_v28  ;;  %1598 = vmatpush3.bf16.msra.mxu0 %v1142_v32  ;;  %v1152_v6 = vld [vmem:[#allocation7 + $0x78] sm:$0xff]  ;;  %v1151_v46 = vld [vmem:[#allocation7 + $0x70] sm:$0xff]  ;;  %v1178_v48 = vld [vmem:[#allocation7 + $0x148] sm:$0xff] }
 0xaf4   :  { %1599 = vmatprep.subr.bf16.mxu0 %v1169_v34  ;;  %v1156_v47 = vld [vmem:[#allocation7 + $0x98] sm:$0xff]  ;;  %v1155_v49 = vld [vmem:[#allocation7 + $0x90] sm:$0xff]  ;;  %v1154_v50 = vld [vmem:[#allocation7 + $0x88] sm:$0xff] }
 0xaf5   :  { %v1159_v51 = vld [vmem:[#allocation7 + $0xb0] sm:$0xff]  ;;  %v1181_v52 = vld [vmem:[#allocation7 + $0x160] sm:$0xff]  ;;  %v1158_v42 = vld [vmem:[#allocation7 + $0xa8] sm:$0xff] }
 0xaf6   :  { %1208 = vmatpush1.bf16.msra.mxu1 %v1143_v31  ;;  %v1157_v53 = vld [vmem:[#allocation7 + $0xa0] sm:$0xff]  ;;  %v1162_v54 = vld [vmem:[#allocation7 + $0xc8] sm:$0xff]  ;;  %v1184_v55 = vld [vmem:[#allocation7 + $0x178] sm:$0xff] }
 0xaf7   :  { %1209 = vmatprep.subr.bf16.mxu1 %v1147_v33  ;;  %1600 = vmatpush3.bf16.msra.mxu0 %v1145_v37  ;;  %v1161_v56 = vld [vmem:[#allocation7 + $0xc0] sm:$0xff]  ;;  %v1160_v57 = vld [vmem:[#allocation7 + $0xb8] sm:$0xff]  ;;  %v1167_v61 = vld [vmem:[#allocation7 + $0xf0] sm:$0xff] }
 0xaf8   :  { %1601 = vmatprep.subr.bf16.mxu0 %v1172_v39  ;;  %v1165_v58 = vld [vmem:[#allocation7 + $0xe0] sm:$0xff]  ;;  %v1164_v59 = vld [vmem:[#allocation7 + $0xd8] sm:$0xff]  ;;  %v1171_v62 = vld [vmem:[#allocation7 + $0x110] sm:$0xff] }
 0xaf9   :  { %v1168_v60 = vld [vmem:[#allocation7 + $0xf8] sm:$0xff]  ;;  %v1170_v26 = vld [vmem:[#allocation7 + $0x108] sm:$0xff]  ;;  %v1173_v0 = vld [vmem:[#allocation7 + $0x120] sm:$0xff] }
 0xafa   :  { %1210 = vmatpush1.bf16.msra.mxu1 %v1146_v35  ;;  %v1174_v63 = vld [vmem:[#allocation7 + $0x128] sm:$0xff]  ;;  %v1177_v1 = vld [vmem:[#allocation7 + $0x140] sm:$0xff]  ;;  %v1176_v2 = vld [vmem:[#allocation7 + $0x138] sm:$0xff] }
 0xafb   :  { %1211 = vmatprep.subr.bf16.mxu1 %v1150_v38  ;;  %1602 = vmatpush3.bf16.msra.mxu0 %v1148_v43  ;;  %v1180_v3 = vld [vmem:[#allocation7 + $0x158] sm:$0xff]  ;;  %v1179_v5 = vld [vmem:[#allocation7 + $0x150] sm:$0xff]  ;;  %v1182_v8 = vld [vmem:[#allocation7 + $0x168] sm:$0xff] }
 0xafc   :  { %1603 = vmatprep.subr.bf16.mxu0 %v1175_v45  ;;  %v1183_v7 = vld [vmem:[#allocation7 + $0x170] sm:$0xff]  ;;  %v1186_v9 = vld [vmem:[#allocation10 + $0x1a] ss:$8 sm:$0x7] }
 0xafd   :  { %v1199_v11 = vrot.slane %v1186_v9, %v601_v20  ;;  %v1191_v24 = vrot.slane %v1186_v9, %v2199_v22  ;;  %v1195_v25 = vrot.slane %v1186_v9, %v2202_v23 }
 0xafe   :  { %1212 = vmatpush1.bf16.msra.mxu1 %v1149_v41 }
 0xaff   :  { %1213 = vmatprep.subr.bf16.mxu1 %v1153_v44  ;;  %1604 = vmatpush3.bf16.msra.mxu0 %v1151_v46 }
 0xb00   :  { %1605 = vmatprep.subr.bf16.mxu0 %v1178_v48 }
 0xb02   :  { %1214 = vmatpush1.bf16.msra.mxu1 %v1152_v6 }
 0xb03   :  { %1215 = vmatprep.subr.bf16.mxu1 %v1156_v47  ;;  %1606 = vmatpush3.bf16.msra.mxu0 %v1154_v50 }
 0xb04   :  { %1607 = vmatprep.subr.bf16.mxu0 %v1181_v52 }
 0xb06   :  { %1216 = vmatpush1.bf16.msra.mxu1 %v1155_v49 }
 0xb07   :  { %1217 = vmatprep.subr.bf16.mxu1 %v1159_v51  ;;  %1608 = vmatpush3.bf16.msra.mxu0 %v1157_v53 }
 0xb08   :  { %1609 = vmatprep.subr.bf16.mxu0 %v1184_v55 }
 0xb0a   :  { %1218 = vmatpush1.bf16.msra.mxu1 %v1158_v42 }
 0xb0b   :  { %1219 = vmatprep.subr.bf16.mxu1 %v1162_v54  ;;  %1610 = vmatpush3.bf16.msra.mxu0 %v1160_v57 }
 0xb0e   :  { %1220 = vmatpush1.bf16.msra.mxu1 %v1161_v56  ;;  %1277 = vmatmul.mubr.bf16.vlgmr.msra.gmra.mrb[28].mxu0 %v2239_v17 }
 0xb0f   :  { %1221 = vmatprep.subr.bf16.mxu1 %v1165_v58 }
 0xb12   :  { %1222 = vmatpush1.bf16.msra.mxu1 %v1164_v59 }
 0xb13   :  { %1223 = vmatprep.subr.bf16.mxu1 %v1168_v60 }
 0xb16   :  { %1224 = vmatpush1.bf16.msra.mxu1 %v1167_v61 }
 0xb17   :  { %1225 = vmatprep.subr.bf16.mxu1 %v1171_v62 }
 0xb1a   :  { %1226 = vmatpush1.bf16.msra.mxu1 %v1170_v26 }
 0xb1b   :  { %1227 = vmatprep.subr.bf16.mxu1 %v1174_v63 }
 0xb1e   :  { %1228 = vmatpush1.bf16.msra.mxu1 %v1173_v0 }
 0xb1f   :  { %1229 = vmatprep.subr.bf16.mxu1 %v1177_v1 }
 0xb22   :  { %1230 = vmatpush1.bf16.msra.mxu1 %v1176_v2 }
 0xb23   :  { %1231 = vmatprep.subr.bf16.mxu1 %v1180_v3 }
 0xb26   :  { %1232 = vmatpush1.bf16.msra.mxu1 %v1179_v5 }
 0xb27   :  { %1233 = vmatprep.subr.bf16.mxu1 %v1183_v7 }
 0xb2a   :  { %1234 = vmatpush1.bf16.msra.mxu1 %v1182_v8 }
 0xb2d   :  { %1236 = vmatmul.mubr.bf16.vlgmr.msra.gmra.mrb[16].mxu1 %v2239_v17 }
 0xbe1   :  { %v1611_v10 = vpop.f32.mrb[28].mxu0 }
 0xbe2   :  { %v1612_v12 = vpop.f32.mrb[29].mxu0 }
 0xbe3   :  { %v1613_v13 = vadd.f32 %v1612_v12, %v1611_v10  ;;  %v1614_v14 = vpop.f32.mrb[30].mxu0 }
 0xbe4   :  { %v1615_v15 = vpop.f32.mrb[31].mxu0 }
 0xbe5   :  { %v1279_v16 = vadd.f32 %v1613_v13, %v1199_v11 }
 0xbe7   :  { %v1286_v18 = vmax.f32 %v1279_v16, 0.0 }
 0xbe9   :  { %v2245_v21 = vpack.c.bf16 %v1286_v18, %v1286_v18 }
 0xc00   :  { %v1237_v27 = vpop.f32.mrb[16].mxu1 }
 0xc01   :  { %v1238_v28 = vadd.f32 %v1237_v27, %v1191_v24  ;;  %v1239_v17 = vpop.f32.mrb[17].mxu1 }
 0xc02   :  { %v1240_v29 = vadd.f32 %v1239_v17, %v1195_v25  ;;  %v1241_v36 = vpop.f32.mrb[18].mxu1 }
 0xc03   :  { %v1284_v30 = vmax.f32 %v1238_v28, 0.0  ;;  %v1242_v19 = vpop.f32.mrb[19].mxu1 }
 0xc04   :  { %v1285_v20 = vmax.f32 %v1240_v29, 0.0 }
 0xc05   :  { %v2249_v31 = vpack.c.bf16 %v1284_v30, %v1284_v30 }
 0xc06   :  { %v1288_v32 = vpack.c.bf16 %v1285_v20, %v1285_v20 }
 0xc07   :  { %1939 = dma.done.wait [#allocation9 + $0x6], 4096 }
 0xc08   :  { %1940 = vsyncadd [#allocation9 + $0x6], 4294963200  ;;  %1727 = vmatprep.subr.bf16.mxu1 %v1961_v4  ;;  %1351 = vmatprep.mubr.bf16.mxu0 %v1288_v32  ;;  %v1302_v22 = vld [vmem:[#allocation8 + $0x40] sm:$0xff]  ;;  %v1303_v34 = vld [vmem:[#allocation8 + $0x48] sm:$0xff] }
 0xc09   :  { %1743 = vmatprep.mubr.msk.bf16.mxu1 %vm1962_vm0, %v1961_v4  ;;  %1449 = vrot.lane.b32.xlu0 %v2161_v40, %s1949_s25  ;;  %v1294_v23 = vld [vmem:[#allocation8] sm:$0xff]  ;;  %v1311_v35 = vld [vmem:[#allocation8 + $0x88] sm:$0xff]  ;;  %v1304_v38 = vld [vmem:[#allocation8 + $0x50] sm:$0xff] }
 0xc0a   :  { %v1310_v33 = vld [vmem:[#allocation8 + $0x80] sm:$0xff]  ;;  %1617 = vmatprep.subr.bf16.mxu0 %v1302_v22  ;;  %v1295_v37 = vld [vmem:[#allocation8 + $0x8] sm:$0xff]  ;;  %v1312_v39 = vld [vmem:[#allocation8 + $0x90] sm:$0xff] }
 0xc0b   :  { %1728 = vmatpush3.bf16.msra.mxu1 %v1310_v33  ;;  %1618 = vmatpush3.bf16.msra.mxu0 %v1294_v23  ;;  %v1296_v40 = vld [vmem:[#allocation8 + $0x10] sm:$0xff]  ;;  %v1305_v41 = vld [vmem:[#allocation8 + $0x58] sm:$0xff]  ;;  %v1306_v45 = vld [vmem:[#allocation8 + $0x60] sm:$0xff] }
 0xc0c   :  { %1729 = vmatprep.subr.bf16.mxu1 %v1961_v4  ;;  %1619 = vmatprep.subr.bf16.mxu0 %v1303_v34  ;;  %v1313_v43 = vld [vmem:[#allocation8 + $0x98] sm:$0xff]  ;;  %v1314_v6 = vld [vmem:[#allocation8 + $0xa0] sm:$0xff]  ;;  %v1307_v47 = vld [vmem:[#allocation8 + $0x68] sm:$0xff] }
 0xc0d   :  { %v1297_v44 = vld [vmem:[#allocation8 + $0x18] sm:$0xff]  ;;  %v1298_v46 = vld [vmem:[#allocation8 + $0x20] sm:$0xff]  ;;  %v1315_v48 = vld [vmem:[#allocation8 + $0xa8] sm:$0xff] }
 0xc0e   :  { %v1299_v49 = vld [vmem:[#allocation8 + $0x28] sm:$0xff]  ;;  %v1308_v50 = vld [vmem:[#allocation8 + $0x70] sm:$0xff]  ;;  %v1309_v42 = vld [vmem:[#allocation8 + $0x78] sm:$0xff] }
 0xc0f   :  { %1730 = vmatpush3.bf16.msra.mxu1 %v1311_v35  ;;  %1620 = vmatpush3.bf16.msra.mxu0 %v1295_v37  ;;  %v1316_v51 = vld [vmem:[#allocation8 + $0xb0] sm:$0xff]  ;;  %v1317_v53 = vld [vmem:[#allocation8 + $0xb8] sm:$0xff]  ;;  %v1400_v55 = vld [vmem:[#allocation8 + $0xc0] sm:$0xff] }
 0xc10   :  { %1731 = vmatprep.subr.bf16.mxu1 %v1961_v4  ;;  %1621 = vmatprep.subr.bf16.mxu0 %v1304_v38  ;;  %v1300_v52 = vld [vmem:[#allocation8 + $0x30] sm:$0xff]  ;;  %v1301_v54 = vld [vmem:[#allocation8 + $0x38] sm:$0xff]  ;;  %v1401_v56 = vld [vmem:[#allocation8 + $0xc8] sm:$0xff] }
 0xc11   :  { %v1402_v57 = vld [vmem:[#allocation8 + $0xd0] sm:$0xff]  ;;  %v1403_v58 = vld [vmem:[#allocation8 + $0xd8] sm:$0xff]  ;;  %v1404_v59 = vld [vmem:[#allocation8 + $0xe0] sm:$0xff] }
 0xc12   :  { %v1405_v60 = vld [vmem:[#allocation8 + $0xe8] sm:$0xff]  ;;  %v1406_v61 = vld [vmem:[#allocation8 + $0xf0] sm:$0xff]  ;;  %v1407_v62 = vld [vmem:[#allocation8 + $0xf8] sm:$0xff] }
 0xc13   :  { %1732 = vmatpush3.bf16.msra.mxu1 %v1312_v39  ;;  %1622 = vmatpush3.bf16.msra.mxu0 %v1296_v40  ;;  %v1318_v2 = vld [vmem:[#allocation10 + $0x1b] ss:$0 sm:$0xff]  ;;  %v1408_v13 = vld [vmem:[#allocation10 + $0x1c] ss:$0 sm:$0xff] }
 0xc14   :  { %1733 = vmatprep.subr.bf16.mxu1 %v1961_v4  ;;  %1623 = vmatprep.subr.bf16.mxu0 %v1305_v41 }
 0xc17   :  { %1734 = vmatpush3.bf16.msra.mxu1 %v1313_v43  ;;  %1624 = vmatpush3.bf16.msra.mxu0 %v1297_v44 }
 0xc18   :  { %1735 = vmatprep.subr.bf16.mxu1 %v1961_v4  ;;  %1625 = vmatprep.subr.bf16.mxu0 %v1306_v45 }
 0xc1b   :  { %1736 = vmatpush3.bf16.msra.mxu1 %v1314_v6  ;;  %1626 = vmatpush3.bf16.msra.mxu0 %v1298_v46 }
 0xc1c   :  { %1737 = vmatprep.subr.bf16.mxu1 %v1961_v4  ;;  %1627 = vmatprep.subr.bf16.mxu0 %v1307_v47 }
 0xc1f   :  { %1738 = vmatpush3.bf16.msra.mxu1 %v1315_v48  ;;  %1628 = vmatpush3.bf16.msra.mxu0 %v1299_v49 }
 0xc20   :  { %1739 = vmatprep.subr.bf16.mxu1 %v1961_v4  ;;  %1629 = vmatprep.subr.bf16.mxu0 %v1308_v50 }
 0xc23   :  { %1740 = vmatpush3.bf16.msra.mxu1 %v1316_v51  ;;  %1630 = vmatpush3.bf16.msra.mxu0 %v1300_v52 }
 0xc24   :  { %1741 = vmatprep.subr.bf16.mxu1 %v1961_v4  ;;  %1631 = vmatprep.subr.bf16.mxu0 %v1309_v42 }
 0xc27   :  { %1742 = vmatpush3.bf16.msra.mxu1 %v1317_v53  ;;  %1632 = vmatpush3.bf16.msra.mxu0 %v1301_v54 }
 0xc28   :  { %1747 = vmatprep.subr.bf16.mxu0 %v1961_v4 }
 0xc2a   :  { %1744 = vmatmul.mubr.bf16.vlgmr.msra.gmra.mrb[20].mxu1 %v2245_v21  ;;  %1352 = vmatmul.mubr.bf16.vlgmr.msra.gmra.mrb[32].mxu0 %v2249_v31 }
 0xc2b   :  { %1748 = vmatpush3.bf16.msra.mxu0 %v1400_v55  ;;  %1763 = vmatprep.mubr.msk.bf16.mxu0 %vm1962_vm0, %v1961_v4 }
 0xc2c   :  { %1749 = vmatprep.subr.bf16.mxu0 %v1961_v4 }
 0xc2f   :  { %1750 = vmatpush3.bf16.msra.mxu0 %v1401_v56 }
 0xc30   :  { %1751 = vmatprep.subr.bf16.mxu0 %v1961_v4 }
 0xc33   :  { %1752 = vmatpush3.bf16.msra.mxu0 %v1402_v57 }
 0xc34   :  { %1753 = vmatprep.subr.bf16.mxu0 %v1961_v4 }
 0xc37   :  { %1754 = vmatpush3.bf16.msra.mxu0 %v1403_v58 }
 0xc38   :  { %1755 = vmatprep.subr.bf16.mxu0 %v1961_v4 }
 0xc3b   :  { %1756 = vmatpush3.bf16.msra.mxu0 %v1404_v59 }
 0xc3c   :  { %1757 = vmatprep.subr.bf16.mxu0 %v1961_v4 }
 0xc3f   :  { %1758 = vmatpush3.bf16.msra.mxu0 %v1405_v60 }
 0xc40   :  { %1759 = vmatprep.subr.bf16.mxu0 %v1961_v4 }
 0xc43   :  { %1760 = vmatpush3.bf16.msra.mxu0 %v1406_v61 }
 0xc44   :  { %1761 = vmatprep.subr.bf16.mxu0 %v1961_v4 }
 0xc47   :  { %1762 = vmatpush3.bf16.msra.mxu0 %v1407_v62 }
 0xc7b   :  { %v1450_v15 = vpop.permute.xlu0 %1449 }
 0xcfd   :  { %v1393_v26 = vpop.f32.mrb[20].mxu1  ;;  %v1633_v63 = vpop.f32.mrb[32].mxu0 }
 0xcfe   :  { %v1745_v0 = vpop.f32.mrb[21].mxu1  ;;  %v1634_v1 = vpop.f32.mrb[33].mxu0 }
 0xcff   :  { %v1396_v3 = vpop.f32.mrb[22].mxu1  ;;  %v1635_v5 = vadd.f32 %v1634_v1, %v1633_v63  ;;  %v1636_v7 = vpop.f32.mrb[34].mxu0 }
 0xd00   :  { %v1746_v8 = vpop.f32.mrb[23].mxu1  ;;  %v1637_v9 = vpop.f32.mrb[35].mxu0 }
 0xd01   :  { %v1354_v10 = vadd.f32 %v1635_v5, %v1318_v2 }
 0xd03   :  { %v1394_v11 = vadd.f32 %v1393_v26, %v1354_v10 }
 0xd05   :  { %v1399_v12 = vpack.c.bf16 %v1394_v11, %v1394_v11 }
 0xd07   :  { %1764 = vmatmul.mubr.bf16.vlgmr.msra.gmra.mrb[36].mxu0 %v1399_v12 }
 0xdda   :  { %v1443_v14 = vpop.f32.mrb[36].mxu0 }
 0xddb   :  { %v1444_v4 = vadd.f32 %v1443_v14, %v1408_v13  ;;  %v1765_v16 = vpop.f32.mrb[37].mxu0 }
 0xddc   :  { %v1446_v18 = vpop.f32.mrb[38].mxu0 }
 0xddd   :  { %v1451_v21 = vadd.f32 %v1450_v15, %v1444_v4  ;;  %v1766_v24 = vpop.f32.mrb[39].mxu0 }
 0xddf   :  { %1452 = vst [vmem:[%s2288_s10] sm:$0xff] %v1451_v21 }
 0xde0   :  { %1457 = vsyncpa [#allocation11], 1 }
 0xde1   :  { %1458 = vsyncpa [#allocation13], 1 }
 0xde2   :  { %1459 = vsyncmov [#allocation9] }
 0xde5   :  { %s1460_s16 = vpop.sfrf %1459 }
 0xde6   :  { %p1538_p4 = scmp.ne.s32.totalorder %s1460_s16, 0 }
 0xde8   :  { %1464 = shalt.err (%p1538_p4)  }
 0xde9   :  { %1466 = vsyncmov [#allocation9 + $0x1] }
 0xdec   :  { %s1467_s3 = vpop.sfrf %1466 }
 0xded   :  { %p1539_p5 = scmp.ne.s32.totalorder %s1467_s3, 0 }
 0xdef   :  { %1471 = shalt.err (%p1539_p5)  }
 0xdf0   :  { %1473 = vsyncmov [#allocation9 + $0x2] }
 0xdf3   :  { %s1474_s7 = vpop.sfrf %1473 }
 0xdf4   :  { %p1540_p6 = scmp.ne.s32.totalorder %s1474_s7, 0 }
 0xdf6   :  { %1478 = shalt.err (%p1540_p6)  }
 0xdf7   :  { %1480 = vsyncmov [#allocation9 + $0x3] }
 0xdfa   :  { %s1481_s4 = vpop.sfrf %1480 }
 0xdfb   :  { %p1541_p7 = scmp.ne.s32.totalorder %s1481_s4, 0 }
 0xdfd   :  { %1485 = shalt.err (%p1541_p7)  }
 0xdfe   :  { %1487 = vsyncmov [#allocation9 + $0x4] }
 0xe01   :  { %s1488_s10 = vpop.sfrf %1487 }
 0xe02   :  { %p1542_p8 = scmp.ne.s32.totalorder %s1488_s10, 0 }
 0xe04   :  { %1492 = shalt.err (%p1542_p8)  }
 0xe05   :  { %1494 = vsyncmov [#allocation9 + $0x5] }
 0xe08   :  { %s1495_s23 = vpop.sfrf %1494 }
 0xe09   :  { %p1543_p9 = scmp.ne.s32.totalorder %s1495_s23, 0 }
 0xe0b   :  { %1499 = shalt.err (%p1543_p9)  }
 0xe0c   :  { %1501 = vsyncmov [#allocation9 + $0x6] }
 0xe0f   :  { %s1502_s17 = vpop.sfrf %1501 }
 0xe10   :  { %p1544_p10 = scmp.ne.s32.totalorder %s1502_s17, 0 }
 0xe12   :  { %1506 = shalt.err (%p1544_p10)  }

</bundles_post_ra>
